<compile_context>
chip_gen: v7x
topology: tpu7x:2x2x1
jax: 0.10.0
libtpu: 0.0.40
codegen_flags: <defaults>
</compile_context>

<pallas_src>
import functools
import math

import numpy as np
import jax
import jax.numpy as jnp
from jax import lax
from jax.experimental import pallas as pl
from jax.experimental.pallas import tpu as pltpu

EPS = 1e-5  # torch.nn.LayerNorm default


def _ln(x, g, b):
    mu = jnp.mean(x, axis=-1, keepdims=True)
    var = jnp.mean((x - mu) ** 2, axis=-1, keepdims=True)
    return (x - mu) * lax.rsqrt(var + EPS) * g + b


def _bf16(x):
    return x.astype(jnp.bfloat16)


# ----------------------------------------------------------------------------
# Fused per-layer kernel: pair bias + pair transition (chunked), then
# attention + FFN on the node stream.
# ----------------------------------------------------------------------------
def encoder_layer_kernel(
    nodes_ref, edges_ref, mask_ref,
    wqkv_ref, bqkv_ref, wo_ref, bo_ref,
    wpbt_ref, bpb_ref,
    w1_ref, b1_ref, w2_ref, b2_ref,
    we1_ref, be1_ref, we2_ref, be2_ref,
    ln1_g_ref, ln1_b_ref, ln2_g_ref, ln2_b_ref,
    lnp_g_ref, lnp_b_ref,
    nodes_out_ref, edges_out_ref,
    q_sc, k_sc, v_sc, bias_sc,
    *, num_heads, head_dim, chunk_q):
    qt = pl.program_id(1)
    L = nodes_ref.shape[1]
    Dn = nodes_ref.shape[2]
    TQ = nodes_out_ref.shape[1]
    scale = 1.0 / math.sqrt(head_dim)

    # ---- once per batch element: fused QKV projection (nodes already LN'd) --
    @pl.when(qt == 0)
    def _():
        x = nodes_ref[0]                                       # (L, Dn) f32
        qkv = jnp.dot(_bf16(x), wqkv_ref[...],
                      preferred_element_type=jnp.float32) + bqkv_ref[...]
        q_sc[...] = _bf16(qkv[:, :Dn])
        k_sc[...] = _bf16(qkv[:, Dn:2 * Dn])
        v_sc[...] = _bf16(qkv[:, 2 * Dn:])

    # ---- pair bias + pair transition, chunked over query rows.  The edge
    #      tile is consumed (and written back) here, before attention, so the
    #      large (chunk*L, De) intermediates are dead during the attention /
    #      FFN phase (smaller peak VMEM). ----
    n_chunks = TQ // chunk_q
    for ci in range(n_chunks):
        r0 = ci * chunk_q * L                                  # static offset
        e_bf = edges_ref[0, pl.ds(r0, chunk_q * L), :]         # (cq*L, De) bf16

        # Per-head pair bias: one MXU matmul over all heads, then a single
        # transpose to head-major layout (replaces eye-multiply + reduce).
        bias_c = jnp.dot(e_bf, wpbt_ref[...],
                         preferred_element_type=jnp.float32) + bpb_ref[...]
        bias_sc[:, pl.ds(ci * chunk_q, chunk_q), :] = (
            bias_c.T.reshape(num_heads, chunk_q, L))

        # Pair transition MLP + residual + LN (post-LN), early writeback.
        e_f = e_bf.astype(jnp.float32)
        ph = jnp.dot(e_bf, we1_ref[...],
                     preferred_element_type=jnp.float32) + be1_ref[...]
        ph = jax.nn.gelu(ph, approximate=True)  # TODO(synk): exact erf GELU
        upd = jnp.dot(_bf16(ph), we2_ref[...],
                      preferred_element_type=jnp.float32) + be2_ref[...]
        edges_out_ref[0, pl.ds(r0, chunk_q * L), :] = _bf16(
            _ln(e_f + upd, lnp_g_ref[...], lnp_b_ref[...]))

    # ---- multi-head self-attention with per-head pair bias ----
    row0 = qt * TQ
    if TQ % 8 == 0:
        row0 = pl.multiple_of(row0, 8)
    x_rows = nodes_ref[0, pl.ds(row0, TQ), :]                  # (TQ, Dn) f32
    q_rows = q_sc[pl.ds(row0, TQ), :]                          # (TQ, Dn) bf16
    k_all = k_sc[...]
    v_all = v_sc[...]
    neg = (mask_ref[0] - 1.0) * 1e9                            # (1, L)

    ctx_parts = []
    for h in range(num_heads):
        sl = slice(h * head_dim, (h + 1) * head_dim)
        s = lax.dot_general(q_rows[:, sl], k_all[:, sl],
                            (((1,), (1,)), ((), ())),
                            preferred_element_type=jnp.float32) * scale
        s = s + bias_sc[h] + neg
        s = s - jnp.max(s, axis=-1, keepdims=True)
        p = jnp.exp(s)
        p = p / jnp.sum(p, axis=-1, keepdims=True)
        ctx_parts.append(_bf16(jnp.dot(_bf16(p), v_all[:, sl],
                                       preferred_element_type=jnp.float32)))

    # Fused output projection: ONE full-K (Dn) matmul instead of H small ones.
    ctx = jnp.concatenate(ctx_parts, axis=-1)                  # (TQ, Dn) bf16
    attn = jnp.dot(ctx, wo_ref[...],
                   preferred_element_type=jnp.float32) + bo_ref[...]

    x1 = _ln(x_rows + attn, ln1_g_ref[...], ln1_b_ref[...])

    hid = jnp.dot(_bf16(x1), w1_ref[...],
                  preferred_element_type=jnp.float32) + b1_ref[...]
    hid = jax.nn.gelu(hid, approximate=True)  # TODO(synk): exact erf GELU
    ffn = jnp.dot(_bf16(hid), w2_ref[...],
                  preferred_element_type=jnp.float32) + b2_ref[...]
    nodes_out_ref[0] = _ln(x1 + ffn, ln2_g_ref[...], ln2_b_ref[...])


# ----------------------------------------------------------------------------
# VMEM budgeting (generation-aware: 128 MiB on v5e/v6e, 64 MiB on v7x).
# ----------------------------------------------------------------------------
def _vmem_limit_bytes():
    try:
        cap = int(pltpu.get_tpu_info().vmem_capacity_bytes)
    except Exception:
        cap = 64 * 1024 * 1024          # conservative fallback (v7x-sized)
    return int(min(cap * 3 // 4, 96 * 1024 * 1024))


def _compiler_params():
    return pltpu.CompilerParams(
        dimension_semantics=("parallel", "arbitrary"),
        vmem_limit_bytes=_vmem_limit_bytes())


def _weight_bytes(wl):
    return sum(int(np.prod(w.shape)) * w.dtype.itemsize for w in wl)


def _pick_chunk_q(tq, L, De, Dp, limit_bytes=2 << 20):
    """Largest divisor of tq whose (cq*L, max(De,Dp)) f32 temps stay small."""
    best = 1
    for cq in range(1, tq + 1):
        if tq % cq == 0 and cq * L * max(De, Dp) * 4 <= limit_bytes:
            best = cq
    return best


def _estimate_vmem(t, cq, L, Dn, De, Dp, H, F, w_bytes):
    edges_io = 2 * 2 * t * L * De * 2         # in + out, double-buffered, bf16
    nodes_io = 2 * L * Dn * 4 + 2 * t * Dn * 4
    scratch = 3 * L * Dn * 2 + H * t * L * 4  # Q/K/V bf16 + head-major bias
    attn_tmp = 4 * t * L * 4 + 2 * t * Dn * 4
    ffn_tmp = 2 * t * F * 4
    pair_tmp = cq * L * (3 * De + 2 * Dp) * 4
    return edges_io + nodes_io + scratch + attn_tmp + ffn_tmp + pair_tmp + w_bytes


def _pick_tq(L, Dn, De, Dp, H, F, w_bytes, budget):
    cands = sorted({t for t in (256, 128, 64, 32, 16, 8, L)
                    if t <= L and L % t == 0}, reverse=True)
    for t in cands:
        cq = _pick_chunk_q(t, L, De, Dp)
        if _estimate_vmem(t, cq, L, Dn, De, Dp, H, F, w_bytes) <= budget * 9 // 10:
            return t, cq
    t = cands[-1]
    return t, _pick_chunk_q(t, L, De, Dp)


# ----------------------------------------------------------------------------
# Per-layer pallas_call wrapper.
# ----------------------------------------------------------------------------
def encoder_layer_call(nodes, e_flat, mask3, wl, num_heads, head_dim, tq, cq):
    B, L, Dn = nodes.shape
    M, De = e_flat.shape[1], e_flat.shape[2]
    nqt = L // tq
    H = num_heads

    kernel = functools.partial(encoder_layer_kernel, num_heads=num_heads,
                               head_dim=head_dim, chunk_q=cq)

    def _wspec(shape):
        # Weights/biases never change across the grid: single-buffer them when
        # the installed Pallas supports pipeline_mode, else fall back.
        idx = lambda b, qt: (0,) * len(shape)
        try:
            return pl.BlockSpec(shape, idx, pipeline_mode=pl.Buffered(1))
        except Exception:
            return pl.BlockSpec(shape, idx)

    in_specs = [
        pl.BlockSpec((1, L, Dn), lambda b, qt: (b, 0, 0)),
        pl.BlockSpec((1, tq * L, De), lambda b, qt: (b, qt, 0)),
        pl.BlockSpec((1, 1, L), lambda b, qt: (b, 0, 0)),
    ] + [_wspec(w.shape) for w in wl]

    out_shape = (jax.ShapeDtypeStruct((B, L, Dn), jnp.float32),
                 jax.ShapeDtypeStruct((B, M, De), jnp.bfloat16))
    out_specs = (pl.BlockSpec((1, tq, Dn), lambda b, qt: (b, qt, 0)),
                 pl.BlockSpec((1, tq * L, De), lambda b, qt: (b, qt, 0)))

    scratch_shapes = [
        pltpu.VMEM((L, Dn), jnp.bfloat16),     # Q (per batch element)
        pltpu.VMEM((L, Dn), jnp.bfloat16),     # K
        pltpu.VMEM((L, Dn), jnp.bfloat16),     # V
        pltpu.VMEM((H, tq, L), jnp.float32),   # head-major pair bias
    ]

    return pl.pallas_call(
        kernel,
        out_shape=out_shape,
        grid=(B, nqt),
        in_specs=in_specs,
        out_specs=out_specs,
        scratch_shapes=scratch_shapes,
        compiler_params=_compiler_params(),
    )(nodes, e_flat, mask3, *wl)


# ----------------------------------------------------------------------------
# Host-side parameter prep: fused QKV, transposed pair-bias weight, bf16 cast.
# ----------------------------------------------------------------------------
def _prep_layer(lp):
    wqkv = _bf16(jnp.concatenate([lp["wq"], lp["wk"], lp["wv"]], axis=1))
    bqkv = jnp.concatenate([lp["bq"], lp["bk"], lp["bv"]], axis=1)
    return [
        wqkv, bqkv,
        _bf16(lp["wo"]), lp["bo"],
        _bf16(lp["wpb"].T), lp["bpb"],
        _bf16(lp["w1"]), lp["b1"], _bf16(lp["w2"]), lp["b2"],
        _bf16(lp["we1"]), lp["be1"], _bf16(lp["we2"]), lp["be2"],
        lp["ln1_g"], lp["ln1_b"], lp["ln2_g"], lp["ln2_b"],
        lp["lnp_g"], lp["lnp_b"],
    ]


# ----------------------------------------------------------------------------
# Parameter construction (deterministic, synthetic).
# ----------------------------------------------------------------------------
def init_params(key, num_layers, Dn, De, Dp, H, F):
    def dense(k, shape, scale=0.02):
        return (scale * jax.random.normal(k, shape)).astype(jnp.float32)

    keys = jax.random.split(key, num_layers + 1)
    params = {
        "ln_g": jnp.ones((1, Dn), jnp.float32),
        "ln_b": jnp.zeros((1, Dn), jnp.float32),
        "pln_g": jnp.ones((1, De), jnp.float32),
        "pln_b": jnp.zeros((1, De), jnp.float32),
        "layers": [],
    }
    for li in range(num_layers):
        ks = jax.random.split(keys[li + 1], 8)
        lp = {
            "wq": dense(ks[0], (Dn, Dn)), "bq": jnp.zeros((1, Dn), jnp.float32),
            "wk": dense(ks[1], (Dn, Dn)), "bk": jnp.zeros((1, Dn), jnp.float32),
            "wv": dense(ks[2], (Dn, Dn)), "bv": jnp.zeros((1, Dn), jnp.float32),
            "wo": dense(ks[3], (Dn, Dn)), "bo": jnp.zeros((1, Dn), jnp.float32),
            "wpb": dense(ks[4], (H, De)), "bpb": jnp.zeros((1, H), jnp.float32),
            "w1": dense(ks[5], (Dn, F)), "b1": jnp.zeros((1, F), jnp.float32),
            "w2": dense(ks[6], (F, Dn)), "b2": jnp.zeros((1, Dn), jnp.float32),
            "we1": dense(ks[7], (De, Dp)), "be1": jnp.zeros((1, Dp), jnp.float32),
            "we2": dense(jax.random.fold_in(ks[7], 1), (Dp, De)),
            "be2": jnp.zeros((1, De), jnp.float32),
            "ln1_g": jnp.ones((1, Dn), jnp.float32), "ln1_b": jnp.zeros((1, Dn), jnp.float32),
            "ln2_g": jnp.ones((1, Dn), jnp.float32), "ln2_b": jnp.zeros((1, Dn), jnp.float32),
            "lnp_g": jnp.ones((1, De), jnp.float32), "lnp_b": jnp.zeros((1, De), jnp.float32),
        }
        params["layers"].append(lp)
    return params


# ----------------------------------------------------------------------------
# VabsEncoder.forward equivalent (preln=0, sequence_only=0, residue_only=0).
# ----------------------------------------------------------------------------
def vabs_encoder_forward(params, nodes, edges, aa_edges, res_mask,
                         num_heads, head_dim, tq=None):
    B, L, Dn = nodes.shape
    De = edges.shape[-1]
    assert Dn == num_heads * head_dim
    assert L % 8 == 0, "query/key axis must be a multiple of 8 for this kernel"

    # preln=0: initial node / pair LayerNorms.  The edge LN is fused (in XLA)
    # with the bf16 down-cast that the per-layer kernels stream thereafter.
    nodes = _ln(nodes, params["ln_g"], params["ln_b"])
    e_flat = _ln(edges.reshape(B, L * L, De),
                 params["pln_g"], params["pln_b"]).astype(jnp.bfloat16)
    mask3 = res_mask.reshape(B, 1, L).astype(jnp.float32)

    prepped = [_prep_layer(lp) for lp in params["layers"]]

    cq = 1
    if prepped:
        Dp = params["layers"][0]["we1"].shape[1]
        F = params["layers"][0]["w1"].shape[1]
        w_bytes = _weight_bytes(prepped[0])
        budget = _vmem_limit_bytes()
        if tq is None:
            tq, cq = _pick_tq(L, Dn, De, Dp, num_heads, F, w_bytes, budget)
        else:
            if L % tq:
                tq = L
            cq = _pick_chunk_q(tq, L, De, Dp)

    atom_nodes_all_layer = []
    for wl in prepped:
        nodes, e_flat = encoder_layer_call(
            nodes, e_flat, mask3, wl, num_heads, head_dim, tq, cq)
        # TODO(synk): aa_edges (residue-level pair) update is unspecified in
        # the provided source; passed through unchanged.
        atom_nodes_all_layer.append(nodes)

    edges_out = e_flat.astype(jnp.float32).reshape(B, L, L, De)
    return nodes, edges_out, aa_edges, atom_nodes_all_layer


if __name__ == "__main__":
    key = jax.random.PRNGKey(0)
    B, L = 2, 8
    Dn, De, Dp, H, F = 32, 16, 16, 4, 64
    head_dim = Dn // H
    num_layers = 2

    k1, k2, k3, kp = jax.random.split(key, 4)
    nodes = jax.random.normal(k1, (B, L, Dn), dtype=jnp.float32)
    edges = jax.random.normal(k2, (B, L, L, De), dtype=jnp.float32)
    aa_edges = jax.random.normal(k3, (B, L, L, De), dtype=jnp.float32)
    res_mask = jnp.ones((B, L), dtype=jnp.float32).at[1, L - 2:].set(0.0)

    params = init_params(kp, num_layers, Dn, De, Dp, H, F)

    nodes_out, edges_out, aa_edges_out, all_layers = vabs_encoder_forward(
        params, nodes, edges, aa_edges, res_mask, H, head_dim)

    jax.block_until_ready((nodes_out, edges_out, aa_edges_out, all_layers))
    assert nodes_out.shape == (B, L, Dn)
    assert edges_out.shape == (B, L, L, De)
    assert len(all_layers) == num_layers
    assert all(a.shape == (B, L, Dn) for a in all_layers)
    assert bool(jnp.all(jnp.isfinite(nodes_out)))
    assert bool(jnp.all(jnp.isfinite(edges_out)))
    print("KERNEL_OK")
</pallas_src>

<mosaic_0001>
module attributes {stable_mosaic.version = 11 : i64} {
  func.func @encoder_layer_kernel(%arg0: i32, %arg1: i32, %arg2: memref<1x8x32xf32, #tpu.memory_space<vmem>>, %arg3: memref<1x64x16xbf16, #tpu.memory_space<vmem>>, %arg4: memref<1x1x8xf32, #tpu.memory_space<vmem>>, %arg5: memref<32x96xbf16, #tpu.memory_space<vmem>>, %arg6: memref<1x96xf32, #tpu.memory_space<vmem>>, %arg7: memref<32x32xbf16, #tpu.memory_space<vmem>>, %arg8: memref<1x32xf32, #tpu.memory_space<vmem>>, %arg9: memref<16x4xbf16, #tpu.memory_space<vmem>>, %arg10: memref<1x4xf32, #tpu.memory_space<vmem>>, %arg11: memref<32x64xbf16, #tpu.memory_space<vmem>>, %arg12: memref<1x64xf32, #tpu.memory_space<vmem>>, %arg13: memref<64x32xbf16, #tpu.memory_space<vmem>>, %arg14: memref<1x32xf32, #tpu.memory_space<vmem>>, %arg15: memref<16x16xbf16, #tpu.memory_space<vmem>>, %arg16: memref<1x16xf32, #tpu.memory_space<vmem>>, %arg17: memref<16x16xbf16, #tpu.memory_space<vmem>>, %arg18: memref<1x16xf32, #tpu.memory_space<vmem>>, %arg19: memref<1x32xf32, #tpu.memory_space<vmem>>, %arg20: memref<1x32xf32, #tpu.memory_space<vmem>>, %arg21: memref<1x32xf32, #tpu.memory_space<vmem>>, %arg22: memref<1x32xf32, #tpu.memory_space<vmem>>, %arg23: memref<1x16xf32, #tpu.memory_space<vmem>>, %arg24: memref<1x16xf32, #tpu.memory_space<vmem>>, %arg25: memref<1x8x32xf32, #tpu.memory_space<vmem>>, %arg26: memref<1x64x16xbf16, #tpu.memory_space<vmem>>, %arg27: memref<8x32xbf16, #tpu.memory_space<vmem>>, %arg28: memref<8x32xbf16, #tpu.memory_space<vmem>>, %arg29: memref<8x32xbf16, #tpu.memory_space<vmem>>, %arg30: memref<4x8x8xf32, #tpu.memory_space<vmem>>) attributes {dimension_semantics = [#tpu.dimension_semantics<parallel>, #tpu.dimension_semantics<arbitrary>], iteration_bounds = array<i64: 2, 1>, scalar_prefetch = 0 : i64, scratch_operands = 4 : i64, tpu.core_type = #tpu.core_type<tc>, window_params = [{transform_indices = @transform_0, window_bounds = array<i64: 1, 8, 32>}, {transform_indices = @transform_1, window_bounds = array<i64: 1, 64, 16>}, {transform_indices = @transform_2, window_bounds = array<i64: 1, 1, 8>}, {pipeline_mode = #tpu.pipeline_mode<synchronous>, transform_indices = @transform_3, window_bounds = array<i64: 32, 96>}, {pipeline_mode = #tpu.pipeline_mode<synchronous>, transform_indices = @transform_4, window_bounds = array<i64: 1, 96>}, {pipeline_mode = #tpu.pipeline_mode<synchronous>, transform_indices = @transform_5, window_bounds = array<i64: 32, 32>}, {pipeline_mode = #tpu.pipeline_mode<synchronous>, transform_indices = @transform_6, window_bounds = array<i64: 1, 32>}, {pipeline_mode = #tpu.pipeline_mode<synchronous>, transform_indices = @transform_7, window_bounds = array<i64: 16, 4>}, {pipeline_mode = #tpu.pipeline_mode<synchronous>, transform_indices = @transform_8, window_bounds = array<i64: 1, 4>}, {pipeline_mode = #tpu.pipeline_mode<synchronous>, transform_indices = @transform_9, window_bounds = array<i64: 32, 64>}, {pipeline_mode = #tpu.pipeline_mode<synchronous>, transform_indices = @transform_10, window_bounds = array<i64: 1, 64>}, {pipeline_mode = #tpu.pipeline_mode<synchronous>, transform_indices = @transform_11, window_bounds = array<i64: 64, 32>}, {pipeline_mode = #tpu.pipeline_mode<synchronous>, transform_indices = @transform_12, window_bounds = array<i64: 1, 32>}, {pipeline_mode = #tpu.pipeline_mode<synchronous>, transform_indices = @transform_13, window_bounds = array<i64: 16, 16>}, {pipeline_mode = #tpu.pipeline_mode<synchronous>, transform_indices = @transform_14, window_bounds = array<i64: 1, 16>}, {pipeline_mode = #tpu.pipeline_mode<synchronous>, transform_indices = @transform_15, window_bounds = array<i64: 16, 16>}, {pipeline_mode = #tpu.pipeline_mode<synchronous>, transform_indices = @transform_16, window_bounds = array<i64: 1, 16>}, {pipeline_mode = #tpu.pipeline_mode<synchronous>, transform_indices = @transform_17, window_bounds = array<i64: 1, 32>}, {pipeline_mode = #tpu.pipeline_mode<synchronous>, transform_indices = @transform_18, window_bounds = array<i64: 1, 32>}, {pipeline_mode = #tpu.pipeline_mode<synchronous>, transform_indices = @transform_19, window_bounds = array<i64: 1, 32>}, {pipeline_mode = #tpu.pipeline_mode<synchronous>, transform_indices = @transform_20, window_bounds = array<i64: 1, 32>}, {pipeline_mode = #tpu.pipeline_mode<synchronous>, transform_indices = @transform_21, window_bounds = array<i64: 1, 16>}, {pipeline_mode = #tpu.pipeline_mode<synchronous>, transform_indices = @transform_22, window_bounds = array<i64: 1, 16>}, {transform_indices = @transform_23, window_bounds = array<i64: 1, 8, 32>}, {transform_indices = @transform_24, window_bounds = array<i64: 1, 64, 16>}]} {
    %c0_i32 = arith.constant 0 : i32
    %0 = arith.cmpi eq, %arg1, %c0_i32 : i32
    %1 = arith.extui %0 : i1 to i32
    %c0_i32_0 = arith.constant 0 : i32
    %2 = arith.cmpi ne, %1, %c0_i32_0 : i32
    scf.if %2 {
      %c0_117 = arith.constant 0 : index
      %c0_118 = arith.constant 0 : index
      %c0_119 = arith.constant 0 : index
      %258 = vector.load %arg2[%c0_117, %c0_118, %c0_119] : memref<1x8x32xf32, #tpu.memory_space<vmem>>, vector<1x8x32xf32>
      %259 = vector.shape_cast %258 : vector<1x8x32xf32> to vector<8x32xf32>
      %260 = arith.truncf %259 : vector<8x32xf32> to vector<8x32xbf16>
      %c0_120 = arith.constant 0 : index
      %c0_121 = arith.constant 0 : index
      %261 = vector.load %arg5[%c0_120, %c0_121] : memref<32x96xbf16, #tpu.memory_space<vmem>>, vector<32x96xbf16>
      %cst_122 = arith.constant dense<0.000000e+00> : vector<8x96xf32>
      %262 = tpu.matmul %260, %261, %cst_122 {dimension_numbers = #tpu.dot_dimension_numbers<[1], [0], [0], [1], [0, 0, 1, 1], [], []>} : vector<8x32xbf16>, vector<32x96xbf16>, vector<8x96xf32> -> vector<8x96xf32>
      %c0_123 = arith.constant 0 : index
      %c0_124 = arith.constant 0 : index
      %263 = vector.load %arg6[%c0_123, %c0_124] : memref<1x96xf32, #tpu.memory_space<vmem>>, vector<1x96xf32>
      %264 = vector.broadcast %263 : vector<1x96xf32> to vector<8x96xf32>
      %265 = arith.addf %262, %264 : vector<8x96xf32>
      %266 = vector.extract_strided_slice %265 {offsets = [0, 0], sizes = [8, 32], strides = [1, 1]} : vector<8x96xf32> to vector<8x32xf32>
      %267 = arith.truncf %266 : vector<8x32xf32> to vector<8x32xbf16>
      %c0_125 = arith.constant 0 : index
      %c0_126 = arith.constant 0 : index
      %268 = vector.load %arg27[%c0_125, %c0_126] : memref<8x32xbf16, #tpu.memory_space<vmem>>, vector<8x32xbf16>
      tpu.vector_store %arg27[%c0_125, %c0_126], %267 {strides = array<i32>} : memref<8x32xbf16, #tpu.memory_space<vmem>>, vector<8x32xbf16>,
      %269 = vector.extract_strided_slice %265 {offsets = [0, 32], sizes = [8, 32], strides = [1, 1]} : vector<8x96xf32> to vector<8x32xf32>
      %270 = arith.truncf %269 : vector<8x32xf32> to vector<8x32xbf16>
      %c0_127 = arith.constant 0 : index
      %c0_128 = arith.constant 0 : index
      %271 = vector.load %arg28[%c0_127, %c0_128] : memref<8x32xbf16, #tpu.memory_space<vmem>>, vector<8x32xbf16>
      tpu.vector_store %arg28[%c0_127, %c0_128], %270 {strides = array<i32>} : memref<8x32xbf16, #tpu.memory_space<vmem>>, vector<8x32xbf16>,
      %272 = vector.extract_strided_slice %265 {offsets = [0, 64], sizes = [8, 32], strides = [1, 1]} : vector<8x96xf32> to vector<8x32xf32>
      %273 = arith.truncf %272 : vector<8x32xf32> to vector<8x32xbf16>
      %c0_129 = arith.constant 0 : index
      %c0_130 = arith.constant 0 : index
      %274 = vector.load %arg29[%c0_129, %c0_130] : memref<8x32xbf16, #tpu.memory_space<vmem>>, vector<8x32xbf16>
      tpu.vector_store %arg29[%c0_129, %c0_130], %273 {strides = array<i32>} : memref<8x32xbf16, #tpu.memory_space<vmem>>, vector<8x32xbf16>,
    } else {
    }
    %c0 = arith.constant 0 : index
    %c0_1 = arith.constant 0 : index
    %c0_2 = arith.constant 0 : index
    %3 = vector.load %arg3[%c0, %c0_1, %c0_2] : memref<1x64x16xbf16, #tpu.memory_space<vmem>>, vector<1x64x16xbf16>
    %4 = vector.shape_cast %3 : vector<1x64x16xbf16> to vector<64x16xbf16>
    %c0_3 = arith.constant 0 : index
    %c0_4 = arith.constant 0 : index
    %5 = vector.load %arg9[%c0_3, %c0_4] : memref<16x4xbf16, #tpu.memory_space<vmem>>, vector<16x4xbf16>
    %cst = arith.constant dense<0.000000e+00> : vector<64x4xf32>
    %6 = tpu.matmul %4, %5, %cst {dimension_numbers = #tpu.dot_dimension_numbers<[1], [0], [0], [1], [0, 0, 1, 1], [], []>} : vector<64x16xbf16>, vector<16x4xbf16>, vector<64x4xf32> -> vector<64x4xf32>
    %c0_5 = arith.constant 0 : index
    %c0_6 = arith.constant 0 : index
    %7 = vector.load %arg10[%c0_5, %c0_6] : memref<1x4xf32, #tpu.memory_space<vmem>>, vector<1x4xf32>
    %8 = vector.broadcast %7 : vector<1x4xf32> to vector<64x4xf32>
    %9 = arith.addf %6, %8 : vector<64x4xf32>
    %10 = tpu.transpose %9, [1, 0] : vector<64x4xf32> -> vector<4x64xf32>
    %11 = vector.shape_cast %10 : vector<4x64xf32> to vector<4x8x8xf32>
    %c0_7 = arith.constant 0 : index
    %c0_8 = arith.constant 0 : index
    %c0_9 = arith.constant 0 : index
    %12 = vector.load %arg30[%c0_7, %c0_8, %c0_9] : memref<4x8x8xf32, #tpu.memory_space<vmem>>, vector<4x8x8xf32>
    tpu.vector_store %arg30[%c0_7, %c0_8, %c0_9], %11 {strides = array<i32>} : memref<4x8x8xf32, #tpu.memory_space<vmem>>, vector<4x8x8xf32>,
    %13 = arith.extf %4 : vector<64x16xbf16> to vector<64x16xf32>
    %c0_10 = arith.constant 0 : index
    %c0_11 = arith.constant 0 : index
    %14 = vector.load %arg15[%c0_10, %c0_11] : memref<16x16xbf16, #tpu.memory_space<vmem>>, vector<16x16xbf16>
    %cst_12 = arith.constant dense<0.000000e+00> : vector<64x16xf32>
    %15 = tpu.matmul %4, %14, %cst_12 {dimension_numbers = #tpu.dot_dimension_numbers<[1], [0], [0], [1], [0, 0, 1, 1], [], []>} : vector<64x16xbf16>, vector<16x16xbf16>, vector<64x16xf32> -> vector<64x16xf32>
    %c0_13 = arith.constant 0 : index
    %c0_14 = arith.constant 0 : index
    %16 = vector.load %arg16[%c0_13, %c0_14] : memref<1x16xf32, #tpu.memory_space<vmem>>, vector<1x16xf32>
    %17 = vector.broadcast %16 : vector<1x16xf32> to vector<64x16xf32>
    %18 = arith.addf %15, %17 : vector<64x16xf32>
    %19 = arith.mulf %18, %18 : vector<64x16xf32>
    %20 = arith.mulf %18, %19 : vector<64x16xf32>
    %cst_15 = arith.constant 4.471500e-02 : f32
    %21 = vector.broadcast %cst_15 : f32 to vector<64x16xf32>
    %22 = arith.mulf %21, %20 : vector<64x16xf32>
    %23 = arith.addf %18, %22 : vector<64x16xf32>
    %cst_16 = arith.constant 0.797884583 : f32
    %24 = vector.broadcast %cst_16 : f32 to vector<64x16xf32>
    %25 = arith.mulf %24, %23 : vector<64x16xf32>
    %26 = math.tanh %25 : vector<64x16xf32>
    %cst_17 = arith.constant 1.000000e+00 : f32
    %27 = vector.broadcast %cst_17 : f32 to vector<64x16xf32>
    %28 = arith.addf %27, %26 : vector<64x16xf32>
    %cst_18 = arith.constant 5.000000e-01 : f32
    %29 = vector.broadcast %cst_18 : f32 to vector<64x16xf32>
    %30 = arith.mulf %29, %28 : vector<64x16xf32>
    %31 = arith.mulf %18, %30 : vector<64x16xf32>
    %32 = arith.truncf %31 : vector<64x16xf32> to vector<64x16xbf16>
    %c0_19 = arith.constant 0 : index
    %c0_20 = arith.constant 0 : index
    %33 = vector.load %arg17[%c0_19, %c0_20] : memref<16x16xbf16, #tpu.memory_space<vmem>>, vector<16x16xbf16>
    %cst_21 = arith.constant dense<0.000000e+00> : vector<64x16xf32>
    %34 = tpu.matmul %32, %33, %cst_21 {dimension_numbers = #tpu.dot_dimension_numbers<[1], [0], [0], [1], [0, 0, 1, 1], [], []>} : vector<64x16xbf16>, vector<16x16xbf16>, vector<64x16xf32> -> vector<64x16xf32>
    %c0_22 = arith.constant 0 : index
    %c0_23 = arith.constant 0 : index
    %35 = vector.load %arg18[%c0_22, %c0_23] : memref<1x16xf32, #tpu.memory_space<vmem>>, vector<1x16xf32>
    %36 = vector.broadcast %35 : vector<1x16xf32> to vector<64x16xf32>
    %37 = arith.addf %34, %36 : vector<64x16xf32>
    %38 = arith.addf %13, %37 : vector<64x16xf32>
    %c0_24 = arith.constant 0 : index
    %c0_25 = arith.constant 0 : index
    %39 = vector.load %arg23[%c0_24, %c0_25] : memref<1x16xf32, #tpu.memory_space<vmem>>, vector<1x16xf32>
    %c0_26 = arith.constant 0 : index
    %c0_27 = arith.constant 0 : index
    %40 = vector.load %arg24[%c0_26, %c0_27] : memref<1x16xf32, #tpu.memory_space<vmem>>, vector<1x16xf32>
    %cst_28 = arith.constant dense<0.000000e+00> : vector<64xf32>
    %41 = vector.multi_reduction <add>, %38, %cst_28 [1] : vector<64x16xf32> to vector<64xf32>
    %42 = vector.shape_cast %41 : vector<64xf32> to vector<64x1xf32>
    %cst_29 = arith.constant 1.600000e+01 : f32
    %43 = vector.broadcast %cst_29 : f32 to vector<64x1xf32>
    %44 = arith.divf %42, %43 : vector<64x1xf32>
    %45 = vector.broadcast %44 : vector<64x1xf32> to vector<64x16xf32>
    %46 = arith.subf %38, %45 : vector<64x16xf32>
    %47 = arith.mulf %46, %46 : vector<64x16xf32>
    %cst_30 = arith.constant dense<0.000000e+00> : vector<64xf32>
    %48 = vector.multi_reduction <add>, %47, %cst_30 [1] : vector<64x16xf32> to vector<64xf32>
    %49 = vector.shape_cast %48 : vector<64xf32> to vector<64x1xf32>
    %cst_31 = arith.constant 1.600000e+01 : f32
    %50 = vector.broadcast %cst_31 : f32 to vector<64x1xf32>
    %51 = arith.divf %49, %50 : vector<64x1xf32>
    %52 = vector.broadcast %44 : vector<64x1xf32> to vector<64x16xf32>
    %53 = arith.subf %38, %52 : vector<64x16xf32>
    %cst_32 = arith.constant 9.99999974E-6 : f32
    %54 = vector.broadcast %cst_32 : f32 to vector<64x1xf32>
    %55 = arith.addf %51, %54 : vector<64x1xf32>
    %56 = math.rsqrt %55 : vector<64x1xf32>
    %57 = vector.broadcast %56 : vector<64x1xf32> to vector<64x16xf32>
    %58 = arith.mulf %53, %57 : vector<64x16xf32>
    %59 = vector.broadcast %39 : vector<1x16xf32> to vector<64x16xf32>
    %60 = arith.mulf %58, %59 : vector<64x16xf32>
    %61 = vector.broadcast %40 : vector<1x16xf32> to vector<64x16xf32>
    %62 = arith.addf %60, %61 : vector<64x16xf32>
    %63 = arith.truncf %62 : vector<64x16xf32> to vector<64x16xbf16>
    %c0_33 = arith.constant 0 : index
    %c0_34 = arith.constant 0 : index
    %c0_35 = arith.constant 0 : index
    %64 = vector.load %arg26[%c0_33, %c0_34, %c0_35] : memref<1x64x16xbf16, #tpu.memory_space<vmem>>, vector<1x64x16xbf16>
    %65 = vector.shape_cast %64 : vector<1x64x16xbf16> to vector<64x16xbf16>
    %66 = vector.shape_cast %63 : vector<64x16xbf16> to vector<1x64x16xbf16>
    tpu.vector_store %arg26[%c0_33, %c0_34, %c0_35], %66 {strides = array<i32>} : memref<1x64x16xbf16, #tpu.memory_space<vmem>>, vector<1x64x16xbf16>,
    %c8_i32 = arith.constant 8 : i32
    %67 = arith.muli %arg1, %c8_i32 : i32
    %68 = tpu.assume_multiple %67, 8 : i32
    %c0_36 = arith.constant 0 : index
    %69 = arith.index_cast %68 : i32 to index
    %c0_37 = arith.constant 0 : index
    %70 = vector.load %arg2[%c0_36, %69, %c0_37] : memref<1x8x32xf32, #tpu.memory_space<vmem>>, vector<1x8x32xf32>
    %71 = vector.shape_cast %70 : vector<1x8x32xf32> to vector<8x32xf32>
    %72 = arith.index_cast %68 : i32 to index
    %c0_38 = arith.constant 0 : index
    %73 = vector.load %arg27[%72, %c0_38] : memref<8x32xbf16, #tpu.memory_space<vmem>>, vector<8x32xbf16>
    %c0_39 = arith.constant 0 : index
    %c0_40 = arith.constant 0 : index
    %74 = vector.load %arg28[%c0_39, %c0_40] : memref<8x32xbf16, #tpu.memory_space<vmem>>, vector<8x32xbf16>
    %c0_41 = arith.constant 0 : index
    %c0_42 = arith.constant 0 : index
    %75 = vector.load %arg29[%c0_41, %c0_42] : memref<8x32xbf16, #tpu.memory_space<vmem>>, vector<8x32xbf16>
    %c0_43 = arith.constant 0 : index
    %c0_44 = arith.constant 0 : index
    %c0_45 = arith.constant 0 : index
    %76 = vector.load %arg4[%c0_43, %c0_44, %c0_45] : memref<1x1x8xf32, #tpu.memory_space<vmem>>, vector<1x1x8xf32>
    %77 = vector.shape_cast %76 : vector<1x1x8xf32> to vector<1x8xf32>
    %cst_46 = arith.constant 1.000000e+00 : f32
    %78 = vector.broadcast %cst_46 : f32 to vector<1x8xf32>
    %79 = arith.subf %77, %78 : vector<1x8xf32>
    %cst_47 = arith.constant 1.000000e+09 : f32
    %80 = vector.broadcast %cst_47 : f32 to vector<1x8xf32>
    %81 = arith.mulf %79, %80 : vector<1x8xf32>
    %82 = vector.extract_strided_slice %73 {offsets = [0, 0], sizes = [8, 8], strides = [1, 1]} : vector<8x32xbf16> to vector<8x8xbf16>
    %83 = vector.extract_strided_slice %74 {offsets = [0, 0], sizes = [8, 8], strides = [1, 1]} : vector<8x32xbf16> to vector<8x8xbf16>
    %cst_48 = arith.constant dense<0.000000e+00> : vector<8x8xf32>
    %84 = tpu.matmul %82, %83, %cst_48 {dimension_numbers = #tpu.dot_dimension_numbers<[1], [1], [0], [0], [0, 0, 1, 0], [], []>} : vector<8x8xbf16>, vector<8x8xbf16>, vector<8x8xf32> -> vector<8x8xf32>
    %cst_49 = arith.constant 0.353553385 : f32
    %85 = vector.broadcast %cst_49 : f32 to vector<8x8xf32>
    %86 = arith.mulf %84, %85 : vector<8x8xf32>
    %c0_50 = arith.constant 0 : index
    %c0_51 = arith.constant 0 : index
    %c0_52 = arith.constant 0 : index
    %87 = vector.load %arg30[%c0_50, %c0_51, %c0_52] : memref<4x8x8xf32, #tpu.memory_space<vmem>>, vector<1x8x8xf32>
    %88 = vector.shape_cast %87 : vector<1x8x8xf32> to vector<8x8xf32>
    %89 = arith.addf %86, %88 : vector<8x8xf32>
    %90 = vector.broadcast %81 : vector<1x8xf32> to vector<8x8xf32>
    %91 = arith.addf %89, %90 : vector<8x8xf32>
    %cst_53 = arith.constant dense<0xFF800000> : vector<8xf32>
    %92 = vector.multi_reduction <maximumf>, %91, %cst_53 [1] : vector<8x8xf32> to vector<8xf32>
    %93 = vector.shape_cast %92 : vector<8xf32> to vector<8x1xf32>
    %94 = vector.broadcast %93 : vector<8x1xf32> to vector<8x8xf32>
    %95 = arith.subf %91, %94 : vector<8x8xf32>
    %96 = math.exp %95 : vector<8x8xf32>
    %cst_54 = arith.constant dense<0.000000e+00> : vector<8xf32>
    %97 = vector.multi_reduction <add>, %96, %cst_54 [1] : vector<8x8xf32> to vector<8xf32>
    %98 = vector.shape_cast %97 : vector<8xf32> to vector<8x1xf32>
    %99 = vector.broadcast %98 : vector<8x1xf32> to vector<8x8xf32>
    %100 = arith.divf %96, %99 : vector<8x8xf32>
    %101 = arith.truncf %100 : vector<8x8xf32> to vector<8x8xbf16>
    %102 = vector.extract_strided_slice %75 {offsets = [0, 0], sizes = [8, 8], strides = [1, 1]} : vector<8x32xbf16> to vector<8x8xbf16>
    %cst_55 = arith.constant dense<0.000000e+00> : vector<8x8xf32>
    %103 = tpu.matmul %101, %102, %cst_55 {dimension_numbers = #tpu.dot_dimension_numbers<[1], [0], [0], [1], [0, 0, 1, 1], [], []>} : vector<8x8xbf16>, vector<8x8xbf16>, vector<8x8xf32> -> vector<8x8xf32>
    %104 = arith.truncf %103 : vector<8x8xf32> to vector<8x8xbf16>
    %105 = vector.extract_strided_slice %73 {offsets = [0, 8], sizes = [8, 8], strides = [1, 1]} : vector<8x32xbf16> to vector<8x8xbf16>
    %106 = vector.extract_strided_slice %74 {offsets = [0, 8], sizes = [8, 8], strides = [1, 1]} : vector<8x32xbf16> to vector<8x8xbf16>
    %cst_56 = arith.constant dense<0.000000e+00> : vector<8x8xf32>
    %107 = tpu.matmul %105, %106, %cst_56 {dimension_numbers = #tpu.dot_dimension_numbers<[1], [1], [0], [0], [0, 0, 1, 0], [], []>} : vector<8x8xbf16>, vector<8x8xbf16>, vector<8x8xf32> -> vector<8x8xf32>
    %cst_57 = arith.constant 0.353553385 : f32
    %108 = vector.broadcast %cst_57 : f32 to vector<8x8xf32>
    %109 = arith.mulf %107, %108 : vector<8x8xf32>
    %c1 = arith.constant 1 : index
    %c0_58 = arith.constant 0 : index
    %c0_59 = arith.constant 0 : index
    %110 = vector.load %arg30[%c1, %c0_58, %c0_59] : memref<4x8x8xf32, #tpu.memory_space<vmem>>, vector<1x8x8xf32>
    %111 = vector.shape_cast %110 : vector<1x8x8xf32> to vector<8x8xf32>
    %112 = arith.addf %109, %111 : vector<8x8xf32>
    %113 = vector.broadcast %81 : vector<1x8xf32> to vector<8x8xf32>
    %114 = arith.addf %112, %113 : vector<8x8xf32>
    %cst_60 = arith.constant dense<0xFF800000> : vector<8xf32>
    %115 = vector.multi_reduction <maximumf>, %114, %cst_60 [1] : vector<8x8xf32> to vector<8xf32>
    %116 = vector.shape_cast %115 : vector<8xf32> to vector<8x1xf32>
    %117 = vector.broadcast %116 : vector<8x1xf32> to vector<8x8xf32>
    %118 = arith.subf %114, %117 : vector<8x8xf32>
    %119 = math.exp %118 : vector<8x8xf32>
    %cst_61 = arith.constant dense<0.000000e+00> : vector<8xf32>
    %120 = vector.multi_reduction <add>, %119, %cst_61 [1] : vector<8x8xf32> to vector<8xf32>
    %121 = vector.shape_cast %120 : vector<8xf32> to vector<8x1xf32>
    %122 = vector.broadcast %121 : vector<8x1xf32> to vector<8x8xf32>
    %123 = arith.divf %119, %122 : vector<8x8xf32>
    %124 = arith.truncf %123 : vector<8x8xf32> to vector<8x8xbf16>
    %125 = vector.extract_strided_slice %75 {offsets = [0, 8], sizes = [8, 8], strides = [1, 1]} : vector<8x32xbf16> to vector<8x8xbf16>
    %cst_62 = arith.constant dense<0.000000e+00> : vector<8x8xf32>
    %126 = tpu.matmul %124, %125, %cst_62 {dimension_numbers = #tpu.dot_dimension_numbers<[1], [0], [0], [1], [0, 0, 1, 1], [], []>} : vector<8x8xbf16>, vector<8x8xbf16>, vector<8x8xf32> -> vector<8x8xf32>
    %127 = arith.truncf %126 : vector<8x8xf32> to vector<8x8xbf16>
    %128 = vector.extract_strided_slice %73 {offsets = [0, 16], sizes = [8, 8], strides = [1, 1]} : vector<8x32xbf16> to vector<8x8xbf16>
    %129 = vector.extract_strided_slice %74 {offsets = [0, 16], sizes = [8, 8], strides = [1, 1]} : vector<8x32xbf16> to vector<8x8xbf16>
    %cst_63 = arith.constant dense<0.000000e+00> : vector<8x8xf32>
    %130 = tpu.matmul %128, %129, %cst_63 {dimension_numbers = #tpu.dot_dimension_numbers<[1], [1], [0], [0], [0, 0, 1, 0], [], []>} : vector<8x8xbf16>, vector<8x8xbf16>, vector<8x8xf32> -> vector<8x8xf32>
    %cst_64 = arith.constant 0.353553385 : f32
    %131 = vector.broadcast %cst_64 : f32 to vector<8x8xf32>
    %132 = arith.mulf %130, %131 : vector<8x8xf32>
    %c2 = arith.constant 2 : index
    %c0_65 = arith.constant 0 : index
    %c0_66 = arith.constant 0 : index
    %133 = vector.load %arg30[%c2, %c0_65, %c0_66] : memref<4x8x8xf32, #tpu.memory_space<vmem>>, vector<1x8x8xf32>
    %134 = vector.shape_cast %133 : vector<1x8x8xf32> to vector<8x8xf32>
    %135 = arith.addf %132, %134 : vector<8x8xf32>
    %136 = vector.broadcast %81 : vector<1x8xf32> to vector<8x8xf32>
    %137 = arith.addf %135, %136 : vector<8x8xf32>
    %cst_67 = arith.constant dense<0xFF800000> : vector<8xf32>
    %138 = vector.multi_reduction <maximumf>, %137, %cst_67 [1] : vector<8x8xf32> to vector<8xf32>
    %139 = vector.shape_cast %138 : vector<8xf32> to vector<8x1xf32>
    %140 = vector.broadcast %139 : vector<8x1xf32> to vector<8x8xf32>
    %141 = arith.subf %137, %140 : vector<8x8xf32>
    %142 = math.exp %141 : vector<8x8xf32>
    %cst_68 = arith.constant dense<0.000000e+00> : vector<8xf32>
    %143 = vector.multi_reduction <add>, %142, %cst_68 [1] : vector<8x8xf32> to vector<8xf32>
    %144 = vector.shape_cast %143 : vector<8xf32> to vector<8x1xf32>
    %145 = vector.broadcast %144 : vector<8x1xf32> to vector<8x8xf32>
    %146 = arith.divf %142, %145 : vector<8x8xf32>
    %147 = arith.truncf %146 : vector<8x8xf32> to vector<8x8xbf16>
    %148 = vector.extract_strided_slice %75 {offsets = [0, 16], sizes = [8, 8], strides = [1, 1]} : vector<8x32xbf16> to vector<8x8xbf16>
    %cst_69 = arith.constant dense<0.000000e+00> : vector<8x8xf32>
    %149 = tpu.matmul %147, %148, %cst_69 {dimension_numbers = #tpu.dot_dimension_numbers<[1], [0], [0], [1], [0, 0, 1, 1], [], []>} : vector<8x8xbf16>, vector<8x8xbf16>, vector<8x8xf32> -> vector<8x8xf32>
    %150 = arith.truncf %149 : vector<8x8xf32> to vector<8x8xbf16>
    %151 = vector.extract_strided_slice %73 {offsets = [0, 24], sizes = [8, 8], strides = [1, 1]} : vector<8x32xbf16> to vector<8x8xbf16>
    %152 = vector.extract_strided_slice %74 {offsets = [0, 24], sizes = [8, 8], strides = [1, 1]} : vector<8x32xbf16> to vector<8x8xbf16>
    %cst_70 = arith.constant dense<0.000000e+00> : vector<8x8xf32>
    %153 = tpu.matmul %151, %152, %cst_70 {dimension_numbers = #tpu.dot_dimension_numbers<[1], [1], [0], [0], [0, 0, 1, 0], [], []>} : vector<8x8xbf16>, vector<8x8xbf16>, vector<8x8xf32> -> vector<8x8xf32>
    %cst_71 = arith.constant 0.353553385 : f32
    %154 = vector.broadcast %cst_71 : f32 to vector<8x8xf32>
    %155 = arith.mulf %153, %154 : vector<8x8xf32>
    %c3 = arith.constant 3 : index
    %c0_72 = arith.constant 0 : index
    %c0_73 = arith.constant 0 : index
    %156 = vector.load %arg30[%c3, %c0_72, %c0_73] : memref<4x8x8xf32, #tpu.memory_space<vmem>>, vector<1x8x8xf32>
    %157 = vector.shape_cast %156 : vector<1x8x8xf32> to vector<8x8xf32>
    %158 = arith.addf %155, %157 : vector<8x8xf32>
    %159 = vector.broadcast %81 : vector<1x8xf32> to vector<8x8xf32>
    %160 = arith.addf %158, %159 : vector<8x8xf32>
    %cst_74 = arith.constant dense<0xFF800000> : vector<8xf32>
    %161 = vector.multi_reduction <maximumf>, %160, %cst_74 [1] : vector<8x8xf32> to vector<8xf32>
    %162 = vector.shape_cast %161 : vector<8xf32> to vector<8x1xf32>
    %163 = vector.broadcast %162 : vector<8x1xf32> to vector<8x8xf32>
    %164 = arith.subf %160, %163 : vector<8x8xf32>
    %165 = math.exp %164 : vector<8x8xf32>
    %cst_75 = arith.constant dense<0.000000e+00> : vector<8xf32>
    %166 = vector.multi_reduction <add>, %165, %cst_75 [1] : vector<8x8xf32> to vector<8xf32>
    %167 = vector.shape_cast %166 : vector<8xf32> to vector<8x1xf32>
    %168 = vector.broadcast %167 : vector<8x1xf32> to vector<8x8xf32>
    %169 = arith.divf %165, %168 : vector<8x8xf32>
    %170 = arith.truncf %169 : vector<8x8xf32> to vector<8x8xbf16>
    %171 = vector.extract_strided_slice %75 {offsets = [0, 24], sizes = [8, 8], strides = [1, 1]} : vector<8x32xbf16> to vector<8x8xbf16>
    %cst_76 = arith.constant dense<0.000000e+00> : vector<8x8xf32>
    %172 = tpu.matmul %170, %171, %cst_76 {dimension_numbers = #tpu.dot_dimension_numbers<[1], [0], [0], [1], [0, 0, 1, 1], [], []>} : vector<8x8xbf16>, vector<8x8xbf16>, vector<8x8xf32> -> vector<8x8xf32>
    %173 = arith.truncf %172 : vector<8x8xf32> to vector<8x8xbf16>
    %174 = tpu.concatenate %104, %127, %150, %173 in 1 : vector<8x8xbf16>, vector<8x8xbf16>, vector<8x8xbf16>, vector<8x8xbf16> -> vector<8x32xbf16>
    %c0_77 = arith.constant 0 : index
    %c0_78 = arith.constant 0 : index
    %175 = vector.load %arg7[%c0_77, %c0_78] : memref<32x32xbf16, #tpu.memory_space<vmem>>, vector<32x32xbf16>
    %cst_79 = arith.constant dense<0.000000e+00> : vector<8x32xf32>
    %176 = tpu.matmul %174, %175, %cst_79 {dimension_numbers = #tpu.dot_dimension_numbers<[1], [0], [0], [1], [0, 0, 1, 1], [], []>} : vector<8x32xbf16>, vector<32x32xbf16>, vector<8x32xf32> -> vector<8x32xf32>
    %c0_80 = arith.constant 0 : index
    %c0_81 = arith.constant 0 : index
    %177 = vector.load %arg8[%c0_80, %c0_81] : memref<1x32xf32, #tpu.memory_space<vmem>>, vector<1x32xf32>
    %178 = vector.broadcast %177 : vector<1x32xf32> to vector<8x32xf32>
    %179 = arith.addf %176, %178 : vector<8x32xf32>
    %180 = arith.addf %71, %179 : vector<8x32xf32>
    %c0_82 = arith.constant 0 : index
    %c0_83 = arith.constant 0 : index
    %181 = vector.load %arg19[%c0_82, %c0_83] : memref<1x32xf32, #tpu.memory_space<vmem>>, vector<1x32xf32>
    %c0_84 = arith.constant 0 : index
    %c0_85 = arith.constant 0 : index
    %182 = vector.load %arg20[%c0_84, %c0_85] : memref<1x32xf32, #tpu.memory_space<vmem>>, vector<1x32xf32>
    %cst_86 = arith.constant dense<0.000000e+00> : vector<8xf32>
    %183 = vector.multi_reduction <add>, %180, %cst_86 [1] : vector<8x32xf32> to vector<8xf32>
    %184 = vector.shape_cast %183 : vector<8xf32> to vector<8x1xf32>
    %cst_87 = arith.constant 3.200000e+01 : f32
    %185 = vector.broadcast %cst_87 : f32 to vector<8x1xf32>
    %186 = arith.divf %184, %185 : vector<8x1xf32>
    %187 = vector.broadcast %186 : vector<8x1xf32> to vector<8x32xf32>
    %188 = arith.subf %180, %187 : vector<8x32xf32>
    %189 = arith.mulf %188, %188 : vector<8x32xf32>
    %cst_88 = arith.constant dense<0.000000e+00> : vector<8xf32>
    %190 = vector.multi_reduction <add>, %189, %cst_88 [1] : vector<8x32xf32> to vector<8xf32>
    %191 = vector.shape_cast %190 : vector<8xf32> to vector<8x1xf32>
    %cst_89 = arith.constant 3.200000e+01 : f32
    %192 = vector.broadcast %cst_89 : f32 to vector<8x1xf32>
    %193 = arith.divf %191, %192 : vector<8x1xf32>
    %194 = vector.broadcast %186 : vector<8x1xf32> to vector<8x32xf32>
    %195 = arith.subf %180, %194 : vector<8x32xf32>
    %cst_90 = arith.constant 9.99999974E-6 : f32
    %196 = vector.broadcast %cst_90 : f32 to vector<8x1xf32>
    %197 = arith.addf %193, %196 : vector<8x1xf32>
    %198 = math.rsqrt %197 : vector<8x1xf32>
    %199 = vector.broadcast %198 : vector<8x1xf32> to vector<8x32xf32>
    %200 = arith.mulf %195, %199 : vector<8x32xf32>
    %201 = vector.broadcast %181 : vector<1x32xf32> to vector<8x32xf32>
    %202 = arith.mulf %200, %201 : vector<8x32xf32>
    %203 = vector.broadcast %182 : vector<1x32xf32> to vector<8x32xf32>
    %204 = arith.addf %202, %203 : vector<8x32xf32>
    %205 = arith.truncf %204 : vector<8x32xf32> to vector<8x32xbf16>
    %c0_91 = arith.constant 0 : index
    %c0_92 = arith.constant 0 : index
    %206 = vector.load %arg11[%c0_91, %c0_92] : memref<32x64xbf16, #tpu.memory_space<vmem>>, vector<32x64xbf16>
    %cst_93 = arith.constant dense<0.000000e+00> : vector<8x64xf32>
    %207 = tpu.matmul %205, %206, %cst_93 {dimension_numbers = #tpu.dot_dimension_numbers<[1], [0], [0], [1], [0, 0, 1, 1], [], []>} : vector<8x32xbf16>, vector<32x64xbf16>, vector<8x64xf32> -> vector<8x64xf32>
    %c0_94 = arith.constant 0 : index
    %c0_95 = arith.constant 0 : index
    %208 = vector.load %arg12[%c0_94, %c0_95] : memref<1x64xf32, #tpu.memory_space<vmem>>, vector<1x64xf32>
    %209 = vector.broadcast %208 : vector<1x64xf32> to vector<8x64xf32>
    %210 = arith.addf %207, %209 : vector<8x64xf32>
    %211 = arith.mulf %210, %210 : vector<8x64xf32>
    %212 = arith.mulf %210, %211 : vector<8x64xf32>
    %cst_96 = arith.constant 4.471500e-02 : f32
    %213 = vector.broadcast %cst_96 : f32 to vector<8x64xf32>
    %214 = arith.mulf %213, %212 : vector<8x64xf32>
    %215 = arith.addf %210, %214 : vector<8x64xf32>
    %cst_97 = arith.constant 0.797884583 : f32
    %216 = vector.broadcast %cst_97 : f32 to vector<8x64xf32>
    %217 = arith.mulf %216, %215 : vector<8x64xf32>
    %218 = math.tanh %217 : vector<8x64xf32>
    %cst_98 = arith.constant 1.000000e+00 : f32
    %219 = vector.broadcast %cst_98 : f32 to vector<8x64xf32>
    %220 = arith.addf %219, %218 : vector<8x64xf32>
    %cst_99 = arith.constant 5.000000e-01 : f32
    %221 = vector.broadcast %cst_99 : f32 to vector<8x64xf32>
    %222 = arith.mulf %221, %220 : vector<8x64xf32>
    %223 = arith.mulf %210, %222 : vector<8x64xf32>
    %224 = arith.truncf %223 : vector<8x64xf32> to vector<8x64xbf16>
    %c0_100 = arith.constant 0 : index
    %c0_101 = arith.constant 0 : index
    %225 = vector.load %arg13[%c0_100, %c0_101] : memref<64x32xbf16, #tpu.memory_space<vmem>>, vector<64x32xbf16>
    %cst_102 = arith.constant dense<0.000000e+00> : vector<8x32xf32>
    %226 = tpu.matmul %224, %225, %cst_102 {dimension_numbers = #tpu.dot_dimension_numbers<[1], [0], [0], [1], [0, 0, 1, 1], [], []>} : vector<8x64xbf16>, vector<64x32xbf16>, vector<8x32xf32> -> vector<8x32xf32>
    %c0_103 = arith.constant 0 : index
    %c0_104 = arith.constant 0 : index
    %227 = vector.load %arg14[%c0_103, %c0_104] : memref<1x32xf32, #tpu.memory_space<vmem>>, vector<1x32xf32>
    %228 = vector.broadcast %227 : vector<1x32xf32> to vector<8x32xf32>
    %229 = arith.addf %226, %228 : vector<8x32xf32>
    %230 = arith.addf %204, %229 : vector<8x32xf32>
    %c0_105 = arith.constant 0 : index
    %c0_106 = arith.constant 0 : index
    %231 = vector.load %arg21[%c0_105, %c0_106] : memref<1x32xf32, #tpu.memory_space<vmem>>, vector<1x32xf32>
    %c0_107 = arith.constant 0 : index
    %c0_108 = arith.constant 0 : index
    %232 = vector.load %arg22[%c0_107, %c0_108] : memref<1x32xf32, #tpu.memory_space<vmem>>, vector<1x32xf32>
    %cst_109 = arith.constant dense<0.000000e+00> : vector<8xf32>
    %233 = vector.multi_reduction <add>, %230, %cst_109 [1] : vector<8x32xf32> to vector<8xf32>
    %234 = vector.shape_cast %233 : vector<8xf32> to vector<8x1xf32>
    %cst_110 = arith.constant 3.200000e+01 : f32
    %235 = vector.broadcast %cst_110 : f32 to vector<8x1xf32>
    %236 = arith.divf %234, %235 : vector<8x1xf32>
    %237 = vector.broadcast %236 : vector<8x1xf32> to vector<8x32xf32>
    %238 = arith.subf %230, %237 : vector<8x32xf32>
    %239 = arith.mulf %238, %238 : vector<8x32xf32>
    %cst_111 = arith.constant dense<0.000000e+00> : vector<8xf32>
    %240 = vector.multi_reduction <add>, %239, %cst_111 [1] : vector<8x32xf32> to vector<8xf32>
    %241 = vector.shape_cast %240 : vector<8xf32> to vector<8x1xf32>
    %cst_112 = arith.constant 3.200000e+01 : f32
    %242 = vector.broadcast %cst_112 : f32 to vector<8x1xf32>
    %243 = arith.divf %241, %242 : vector<8x1xf32>
    %244 = vector.broadcast %236 : vector<8x1xf32> to vector<8x32xf32>
    %245 = arith.subf %230, %244 : vector<8x32xf32>
    %cst_113 = arith.constant 9.99999974E-6 : f32
    %246 = vector.broadcast %cst_113 : f32 to vector<8x1xf32>
    %247 = arith.addf %243, %246 : vector<8x1xf32>
    %248 = math.rsqrt %247 : vector<8x1xf32>
    %249 = vector.broadcast %248 : vector<8x1xf32> to vector<8x32xf32>
    %250 = arith.mulf %245, %249 : vector<8x32xf32>
    %251 = vector.broadcast %231 : vector<1x32xf32> to vector<8x32xf32>
    %252 = arith.mulf %250, %251 : vector<8x32xf32>
    %253 = vector.broadcast %232 : vector<1x32xf32> to vector<8x32xf32>
    %254 = arith.addf %252, %253 : vector<8x32xf32>
    %c0_114 = arith.constant 0 : index
    %c0_115 = arith.constant 0 : index
    %c0_116 = arith.constant 0 : index
    %255 = vector.load %arg25[%c0_114, %c0_115, %c0_116] : memref<1x8x32xf32, #tpu.memory_space<vmem>>, vector<1x8x32xf32>
    %256 = vector.shape_cast %255 : vector<1x8x32xf32> to vector<8x32xf32>
    %257 = vector.shape_cast %254 : vector<8x32xf32> to vector<1x8x32xf32>
    tpu.vector_store %arg25[%c0_114, %c0_115, %c0_116], %257 {strides = array<i32>} : memref<1x8x32xf32, #tpu.memory_space<vmem>>, vector<1x8x32xf32>,
    return
  }
  func.func @transform_0(%arg0: i32, %arg1: i32) -> (i32, i32, i32) {
    %c0_i32 = arith.constant 0 : i32
    %c0_i32_0 = arith.constant 0 : i32
    %c0_i32_1 = arith.constant 0 : i32
    return %arg0, %c0_i32, %c0_i32_0 : i32, i32, i32
  }
  func.func @transform_1(%arg0: i32, %arg1: i32) -> (i32, i32, i32) {
    %c0_i32 = arith.constant 0 : i32
    %c0_i32_0 = arith.constant 0 : i32
    return %arg0, %arg1, %c0_i32 : i32, i32, i32
  }
  func.func @transform_2(%arg0: i32, %arg1: i32) -> (i32, i32, i32) {
    %c0_i32 = arith.constant 0 : i32
    %c0_i32_0 = arith.constant 0 : i32
    %c0_i32_1 = arith.constant 0 : i32
    return %arg0, %c0_i32, %c0_i32_0 : i32, i32, i32
  }
  func.func @transform_3(%arg0: i32, %arg1: i32) -> (i32, i32) {
    %c0_i32 = arith.constant 0 : i32
    %c0_i32_0 = arith.constant 0 : i32
    %c0_i32_1 = arith.constant 0 : i32
    return %c0_i32, %c0_i32_0 : i32, i32
  }
  func.func @transform_4(%arg0: i32, %arg1: i32) -> (i32, i32) {
    %c0_i32 = arith.constant 0 : i32
    %c0_i32_0 = arith.constant 0 : i32
    %c0_i32_1 = arith.constant 0 : i32
    return %c0_i32, %c0_i32_0 : i32, i32
  }
  func.func @transform_5(%arg0: i32, %arg1: i32) -> (i32, i32) {
    %c0_i32 = arith.constant 0 : i32
    %c0_i32_0 = arith.constant 0 : i32
    %c0_i32_1 = arith.constant 0 : i32
    return %c0_i32, %c0_i32_0 : i32, i32
  }
  func.func @transform_6(%arg0: i32, %arg1: i32) -> (i32, i32) {
    %c0_i32 = arith.constant 0 : i32
    %c0_i32_0 = arith.constant 0 : i32
    %c0_i32_1 = arith.constant 0 : i32
    return %c0_i32, %c0_i32_0 : i32, i32
  }
  func.func @transform_7(%arg0: i32, %arg1: i32) -> (i32, i32) {
    %c0_i32 = arith.constant 0 : i32
    %c0_i32_0 = arith.constant 0 : i32
    %c0_i32_1 = arith.constant 0 : i32
    return %c0_i32, %c0_i32_0 : i32, i32
  }
  func.func @transform_8(%arg0: i32, %arg1: i32) -> (i32, i32) {
    %c0_i32 = arith.constant 0 : i32
    %c0_i32_0 = arith.constant 0 : i32
    %c0_i32_1 = arith.constant 0 : i32
    return %c0_i32, %c0_i32_0 : i32, i32
  }
  func.func @transform_9(%arg0: i32, %arg1: i32) -> (i32, i32) {
    %c0_i32 = arith.constant 0 : i32
    %c0_i32_0 = arith.constant 0 : i32
    %c0_i32_1 = arith.constant 0 : i32
    return %c0_i32, %c0_i32_0 : i32, i32
  }
  func.func @transform_10(%arg0: i32, %arg1: i32) -> (i32, i32) {
    %c0_i32 = arith.constant 0 : i32
    %c0_i32_0 = arith.constant 0 : i32
    %c0_i32_1 = arith.constant 0 : i32
    return %c0_i32, %c0_i32_0 : i32, i32
  }
  func.func @transform_11(%arg0: i32, %arg1: i32) -> (i32, i32) {
    %c0_i32 = arith.constant 0 : i32
    %c0_i32_0 = arith.constant 0 : i32
    %c0_i32_1 = arith.constant 0 : i32
    return %c0_i32, %c0_i32_0 : i32, i32
  }
  func.func @transform_12(%arg0: i32, %arg1: i32) -> (i32, i32) {
    %c0_i32 = arith.constant 0 : i32
    %c0_i32_0 = arith.constant 0 : i32
    %c0_i32_1 = arith.constant 0 : i32
    return %c0_i32, %c0_i32_0 : i32, i32
  }
  func.func @transform_13(%arg0: i32, %arg1: i32) -> (i32, i32) {
    %c0_i32 = arith.constant 0 : i32
    %c0_i32_0 = arith.constant 0 : i32
    %c0_i32_1 = arith.constant 0 : i32
    return %c0_i32, %c0_i32_0 : i32, i32
  }
  func.func @transform_14(%arg0: i32, %arg1: i32) -> (i32, i32) {
    %c0_i32 = arith.constant 0 : i32
    %c0_i32_0 = arith.constant 0 : i32
    %c0_i32_1 = arith.constant 0 : i32
    return %c0_i32, %c0_i32_0 : i32, i32
  }
  func.func @transform_15(%arg0: i32, %arg1: i32) -> (i32, i32) {
    %c0_i32 = arith.constant 0 : i32
    %c0_i32_0 = arith.constant 0 : i32
    %c0_i32_1 = arith.constant 0 : i32
    return %c0_i32, %c0_i32_0 : i32, i32
  }
  func.func @transform_16(%arg0: i32, %arg1: i32) -> (i32, i32) {
    %c0_i32 = arith.constant 0 : i32
    %c0_i32_0 = arith.constant 0 : i32
    %c0_i32_1 = arith.constant 0 : i32
    return %c0_i32, %c0_i32_0 : i32, i32
  }
  func.func @transform_17(%arg0: i32, %arg1: i32) -> (i32, i32) {
    %c0_i32 = arith.constant 0 : i32
    %c0_i32_0 = arith.constant 0 : i32
    %c0_i32_1 = arith.constant 0 : i32
    return %c0_i32, %c0_i32_0 : i32, i32
  }
  func.func @transform_18(%arg0: i32, %arg1: i32) -> (i32, i32) {
    %c0_i32 = arith.constant 0 : i32
    %c0_i32_0 = arith.constant 0 : i32
    %c0_i32_1 = arith.constant 0 : i32
    return %c0_i32, %c0_i32_0 : i32, i32
  }
  func.func @transform_19(%arg0: i32, %arg1: i32) -> (i32, i32) {
    %c0_i32 = arith.constant 0 : i32
    %c0_i32_0 = arith.constant 0 : i32
    %c0_i32_1 = arith.constant 0 : i32
    return %c0_i32, %c0_i32_0 : i32, i32
  }
  func.func @transform_20(%arg0: i32, %arg1: i32) -> (i32, i32) {
    %c0_i32 = arith.constant 0 : i32
    %c0_i32_0 = arith.constant 0 : i32
    %c0_i32_1 = arith.constant 0 : i32
    return %c0_i32, %c0_i32_0 : i32, i32
  }
  func.func @transform_21(%arg0: i32, %arg1: i32) -> (i32, i32) {
    %c0_i32 = arith.constant 0 : i32
    %c0_i32_0 = arith.constant 0 : i32
    %c0_i32_1 = arith.constant 0 : i32
    return %c0_i32, %c0_i32_0 : i32, i32
  }
  func.func @transform_22(%arg0: i32, %arg1: i32) -> (i32, i32) {
    %c0_i32 = arith.constant 0 : i32
    %c0_i32_0 = arith.constant 0 : i32
    %c0_i32_1 = arith.constant 0 : i32
    return %c0_i32, %c0_i32_0 : i32, i32
  }
  func.func @transform_23(%arg0: i32, %arg1: i32) -> (i32, i32, i32) {
    %c0_i32 = arith.constant 0 : i32
    %c0_i32_0 = arith.constant 0 : i32
    return %arg0, %arg1, %c0_i32 : i32, i32, i32
  }
  func.func @transform_24(%arg0: i32, %arg1: i32) -> (i32, i32, i32) {
    %c0_i32 = arith.constant 0 : i32
    %c0_i32_0 = arith.constant 0 : i32
    return %arg0, %arg1, %c0_i32 : i32, i32, i32
  }
}

</mosaic_0001>

<bundles_post_ra>
// kernel: tpu_custom_call.1
= control target key start
LH: loop header
LB: loop body
LE: loop exit
PB: predicated region body
PF: predicated region fallthrough
CT: control target
= control target key end

     0   :  { %s3683_s0 = inlined_call_operand.vmem [shape: f32[2,8,32], index: 0, kind: input, shape index: {}]   ;;  %s3684_s1 = inlined_call_operand.vmem [shape: bf16[2,64,16], index: 1, kind: input, shape index: {}]   ;;  %s3685_s2 = inlined_call_operand.vmem [shape: f32[2,1,8], index: 2, kind: input, shape index: {}]   ;;  %s3686_s3 = inlined_call_operand.vmem [shape: bf16[32,96], index: 3, kind: input, shape index: {}]   ;;  %s3687_s4 = inlined_call_operand.vmem [shape: f32[1,96], index: 4, kind: input, shape index: {}]   ;;  %s3688_s5 = inlined_call_operand.vmem [shape: bf16[32,32], index: 5, kind: input, shape index: {}]   ;;  %s3689_s6 = inlined_call_operand.vmem [shape: f32[1,32], index: 6, kind: input, shape index: {}]   ;;  %s3690_s7 = inlined_call_operand.vmem [shape: bf16[16,4], index: 7, kind: input, shape index: {}]   ;;  %s3691_s8 = inlined_call_operand.vmem [shape: f32[1,4], index: 8, kind: input, shape index: {}]   ;;  %s3692_s9 = inlined_call_operand.vmem [shape: bf16[32,64], index: 9, kind: input, shape index: {}]   ;;  %s3693_s10 = inlined_call_operand.vmem [shape: f32[1,64], index: 10, kind: input, shape index: {}]   ;;  %s3694_s11 = inlined_call_operand.vmem [shape: bf16[64,32], index: 11, kind: input, shape index: {}]   ;;  %s3695_s12 = inlined_call_operand.vmem [shape: f32[1,32], index: 12, kind: input, shape index: {}]   ;;  %s3696_s13 = inlined_call_operand.vmem [shape: bf16[16,16], index: 13, kind: input, shape index: {}]   ;;  %s3697_s14 = inlined_call_operand.vmem [shape: f32[1,16], index: 14, kind: input, shape index: {}]   ;;  %s3698_s15 = inlined_call_operand.vmem [shape: bf16[16,16], index: 15, kind: input, shape index: {}]   ;;  %s3699_s16 = inlined_call_operand.vmem [shape: f32[1,16], index: 16, kind: input, shape index: {}]   ;;  %s3700_s17 = inlined_call_operand.vmem [shape: f32[1,32], index: 17, kind: input, shape index: {}]   ;;  %s3701_s18 = inlined_call_operand.vmem [shape: f32[1,32], index: 18, kind: input, shape index: {}]   ;;  %s3702_s19 = inlined_call_operand.vmem [shape: f32[1,32], index: 19, kind: input, shape index: {}]   ;;  %s3703_s20 = inlined_call_operand.vmem [shape: f32[1,32], index: 20, kind: input, shape index: {}]   ;;  %s3704_s21 = inlined_call_operand.vmem [shape: f32[1,16], index: 21, kind: input, shape index: {}]   ;;  %s3705_s22 = inlined_call_operand.vmem [shape: f32[1,16], index: 22, kind: input, shape index: {}]   ;;  %s3706_s23 = inlined_call_operand.hbm [shape: f32[2,8,32], index: 23, kind: output, shape index: {0}]   ;;  %s3707_s24 = inlined_call_operand.vmem [shape: bf16[2,64,16], index: 24, kind: output, shape index: {1}]  }
   0x1   :  { %3716 = sst [smem:[#allocation14_spill]] %s3683_s0 }
   0x2   :  { %3717 = sst [smem:[#allocation15_spill]] %s3684_s1 }
   0x3   :  { %3718 = sst [smem:[#allocation16_spill]] %s3685_s2 }
   0x4   :  { %3719 = sst [smem:[#allocation17_spill]] %s3686_s3 }
   0x5   :  { %3720 = sst [smem:[#allocation18_spill]] %s3687_s4 }
   0x6   :  { %3721 = sst [smem:[#allocation19_spill]] %s3688_s5 }
   0x7   :  { %3722 = sst [smem:[#allocation20_spill]] %s3689_s6 }
   0x8   :  { %3723 = sst [smem:[#allocation21_spill]] %s3690_s7 }
   0x9   :  { %3724 = sst [smem:[#allocation22_spill]] %s3691_s8 }
   0xa   :  { %3725 = sst [smem:[#allocation23_spill]] %s3692_s9 }
   0xb   :  { %3726 = sst [smem:[#allocation24_spill]] %s3693_s10 }
   0xc   :  { %3727 = sst [smem:[#allocation25_spill]] %s3694_s11 }
   0xd   :  { %3728 = sst [smem:[#allocation26_spill]] %s3706_s23 }
   0xe   :  { %30 = vsyncpa [#allocation7], 0 }
   0xf   :  { %32 = vsyncpa [#allocation7 + $0x1], 0  ;;  %s3175_s5 = smov 0   ;;  %s3177_s26 = smov 0  }
  0x10   :  { %s3179_s27 = smov 0   ;;  %s3181_s28 = smov 0  }
  0x11   :  { %s3183_s6 = smov 0   ;;  %s3185_s2 = smov 0  }
  0x12 LB: > { %3729 = sst [smem:[#allocation9_spill]] %s3012_s5  ;;  %s2552_s29 = sadd.s32 4294967295, %s3032_s2   ;;  %s3032_s2 = sphi %s3185_s2, %s38_s2   ;;  %s3028_s6 = sphi %s3183_s6, %s3754_s6   ;;  %s3024_s28 = sphi %s3181_s28, %s3753_s28   ;;  %s3020_s27 = sphi %s3179_s27, %s3752_s27   ;;  %s3016_s26 = sphi %s3177_s26, %s3756_s26   ;;  %s3012_s5 = sphi %s3175_s5, %s3755_s5  }
  0x13   : > { %3730 = sst [smem:[#allocation10_spill]] %s3020_s27  ;;  %s2553_s0 = sadd.s32 4294967294, %s3032_s2  }
  0x14   : > { %3731 = sst [smem:[#allocation11_spill]] %s3028_s6  ;;  %s50_s7 = sadd.s32 1, %s3028_s6 }
  0x15   : > { %s559_s30 = sadd.s32 1, %s3020_s27  ;;  %p52_p0 = scmp.ge.s32.totalorder %s50_s7, 2 }
  0x16   : > { %p569_p1 = scmp.ne.s32.totalorder %s3020_s27, %s3016_s26  ;;  %p570_p2 = scmp.eq.s32.totalorder %s2552_s29, 1 }
  0x17   : > { %p575_p3 = scmp.ne.s32.totalorder %s3016_s26, %s3012_s5  ;;  %s3758_s7 = smov (%p52_p0, %s50_s7), 0 }
  0x18   : > { %3732 = sst [smem:[#allocation12_spill]] %s3758_s7  ;;  %p3215_p4 = por %p570_p2, %p569_p1 }
  0x19   : > { %p576_p5 = scmp.eq.s32.totalorder %s2553_s0, 1  ;;  %s554_s25 = ssub.s32 %s3028_s6, %s3758_s7 }
  0x1a   : > { %p2556_p6 = scmp.ge.s32.totalorder %s3032_s2, 1  ;;  %p557_p7 = scmp.eq.s32.totalorder %s554_s25, 0 }
  0x1b   : > { %p3222_p8 = por %p576_p5, %p575_p3  ;;  %p708_p9 = scmp.lt.s32.totalorder %s3032_s2, 3 }
  0x1c   : > { %s3228_s4 = scalar_select %p557_p7, %s3020_s27, %s559_s30  }
  0x1d   : > { %p709_p10 = pnand %p2556_p6, %p708_p9 }
  0x1e   : > { %3735 = sst [smem:[#allocation13_spill]] %s3228_s4  ;;  %s3736_s5 = sld [smem:[#allocation17_spill]] (!%p709_p10)  ;;  %v3034_v1 = vmov (!%p709_p10), 0.0   ;;  %vm3035_vm0 = vmmov (!%p709_p10), 0   ;;  %vm851_vm1 = vcmask (!%p709_p10), 261120   ;;  %vm952_vm2 = vcmask (!%p709_p10), 130048  }
  0x1f   : > { %712 = sbr.rel (%p709_p10) target bundleno = 2748 (0xabc), region = 112  ;;  %2690 = vmatprep.subr.bf16.mxu0 (!%p709_p10), %v3034_v1  ;;  %2694 = vmatprep.mubr.msk.bf16.mxu0 (!%p709_p10), %vm3035_vm0, %v3034_v1  ;;  %p794_p11 = scmp.lt.s32.totalorder (!%p709_p10), %s3024_s28, 1  ;;  %v2884_v10 = vld [vmem:[%s3696_s13] sm:$0xff] (!%p709_p10)   ;;  %vm896_vm3 = vcmask (!%p709_p10), 257024   ;;  %vm1152_vm4 = vcmask (!%p709_p10), 64512   ;;  %vm1681_vm5 = vcmask (!%p709_p10), 1043456  }
  0x20   : > { %s3738_s29 = sld [smem:[#allocation21_spill]] (!%p709_p10)  ;;  %s3739_s6 = sld [smem:[#allocation14_spill]] (!%p709_p10)  ;;  %v3319_v41 = vld [vmem:[%s3697_s14] ss:$0 sm:$0xff] (!%p709_p10)  ;;  %vm2097_vm6 = vcmask (!%p709_p10), 195584   ;;  %vm1588_vm7 = vcmask (!%p709_p10), 125952  }
  0x21   : > { %s3037_s30 = smov (!%p709_p10), 120   ;;  %s3038_s1 = smov (!%p709_p10), 112   ;;  %vm2313_vm8 = vcmask (!%p709_p10), 523264  }
  0x22   : > { %s3041_s7 = smov (!%p709_p10), 80   ;;  %s3746_s9 = sld [smem:[#allocation23_spill]] (!%p709_p10) }
  0x23   : > { %s3747_s11 = sld [smem:[#allocation25_spill]] (!%p709_p10)  ;;  %s3748_s10 = sld [smem:[#allocation24_spill]] (!%p709_p10) }
  0x24   : > { %s3737_s23 = smov (!%p709_p10), %s3736_s5  ;;  %v2876_v0 = vld [vmem:[%s3736_s5] sm:$0xff] (!%p709_p10)  }
  0x25   : > { %2691 = vmatpush3.bf16.msra.mxu0 (!%p709_p10), %v2876_v0  ;;  %v2877_v2 = vld [vmem:[%s3737_s23 + $0x8] sm:$0xff] (!%p709_p10)  }
  0x26   : > { %2692 = vmatprep.subr.bf16.mxu0 %v3034_v1  ;;  %v2878_v3 = vld [vmem:[%s3738_s29] sm:$0xff]   ;;  %s3245_s5 = scalar_select %p794_p11, %s3024_s28, 1 }
  0x27   : > { %2698 = vmatprep.subr.bf16.mxu1 %v2878_v3  ;;  %s3740_s29 = sld [smem:[#allocation15_spill]] }
  0x28   : > { %s2558_s0 = sshll.u32 %s3245_s5, 3  ;;  %s2634_s25 = sshll.u32 %s3245_s5, 5  ;;  %2699 = vmatpush3.bf16.msra.mxu1 %v2878_v3 }
  0x29   : > { %2693 = vmatpush3.bf16.msra.mxu0 %v2877_v2  ;;  %s797_s4 = scalar_lea.vmem %s3739_s6, %s2558_s0  ;;  %2804 = vmatprep.subr.bf16.mxu1 %v2884_v10  ;;  %s3036_s0 = smov 96  }
  0x2a   : > { %v3252_v4 = vld [vmem:[%s797_s4] sm:$0xff]  ;;  %2708 = vmatprep.subr.bf16.mxu0 %v2884_v10  ;;  %s3741_s4 = sld [smem:[#allocation18_spill]]  ;;  %s3743_s6 = sld [smem:[#allocation16_spill]] }
  0x2b   : > { %v827_v5 = vpack.c.bf16 %v3252_v4, %v3252_v4 }
  0x2d   : > { %s806_s27 = scalar_lea.vmem %s3740_s29, %s2634_s25  ;;  %2695 = vmatmul.mubr.msk.bf16.vlgmr.msra.gmra.mrb[0].mxu0 %vm851_vm1, %v827_v5  ;;  %s3039_s29 = smov 104  }
  0x2e   : > { %v3261_v6 = vld [vmem:[%s806_s27] sm:$0xff]   ;;  %v3263_v7 = vld [vmem:[%s806_s27 + $0x8] sm:$0xff]   ;;  %v3265_v8 = vld [vmem:[%s806_s27 + $0x10] sm:$0xff]   ;;  %2709 = vmatpush3.bf16.msra.mxu0 %v2884_v10 }
  0x2f   : > { %2700 = vmatprep.mubr.msk.bf16.mxu1 %vm952_vm2, %v3261_v6  ;;  %2710 = vmatprep.mubr.msk.bf16.mxu0 %vm952_vm2, %v3261_v6  ;;  %v3276_v9 = vld [vmem:[%s806_s27 + $0x18] sm:$0xff]   ;;  %s3742_s27 = sld [smem:[#allocation22_spill]] }
  0x30   : > { %2701 = vmatmul.mubr.msk.bf16.vlgmr.msra.gmra.mrb[0].mxu1 %vm952_vm2, %v3263_v7  ;;  %2728 = vmatprep.subr.bf16.mxu0 %v3034_v1  ;;  %v2563_v11 = vld [vmem:[%s3741_s4] ss:$0 sm:$0xff] }
  0x31   : > { %2704 = vmatprep.mubr.msk.bf16.mxu1 %vm952_vm2, %v3265_v8  ;;  %2805 = vmatpush3.bf16.msra.mxu1 %v2884_v10 }
  0x35   : > { %2711 = vmatmul.mubr.msk.bf16.vlgmr.msra.gmra.mrb[4].mxu0 %vm952_vm2, %v3263_v7  ;;  %v2568_v32 = vld [vmem:[%s3742_s27] ss:$0 sm:$0xff]  ;;  %s3040_s27 = smov 88  }
  0x36   : > { %2730 = vmatprep.mubr.msk.bf16.mxu0 %vm3035_vm0, %v3034_v1 }
  0x38   : > { %2705 = vmatmul.mubr.msk.bf16.gmra.mrb[4].mxu1 %vm952_vm2, %v3276_v9 }
  0x39   : > { %2714 = vmatprep.mubr.msk.bf16.mxu1 %vm952_vm2, %v3265_v8 }
  0x40   : > { %2715 = vmatmul.mubr.msk.bf16.vlgmr.msra.gmra.mrb[8].mxu1 %vm952_vm2, %v3276_v9 }
 0x100   : > { %v889_v12 = vpop.f32.mrb[0].mxu0 }
 0x101   : > { %v890_v13 = vadd.f32 %v2563_v11, %v889_v12  ;;  %v2696_v14 = vpop.f32.mrb[1].mxu0 }
 0x102   : > { %v892_v15 = vpop.f32.mrb[2].mxu0 }
 0x103   : > { %v3295_v16 = vpack.c.bf16 %v890_v13, %v890_v13  ;;  %v2697_v17 = vpop.f32.mrb[3].mxu0  ;;  %v2702_v18 = vpop.f32.mrb[0].mxu1 }
 0x104   : > { %v999_v19 = vpop.f32.mrb[1].mxu1  ;;  %v1008_v35 = vadd.f32 %v2702_v18, %v2568_v32 }
 0x105   : > { %897 = vst.msk [vmem:[#allocation2] sm:$0xf] %vm896_vm3, %v3295_v16  ;;  %901 = vrot.lane.b32.xlu0 %v3295_v16, %s3036_s0  ;;  %v2703_v21 = vpop.f32.mrb[2].mxu1  ;;  %v1000_v33 = vadd.f32 %v2568_v32, %v999_v19 }
 0x106   : > { %v1002_v23 = vpop.f32.mrb[3].mxu1  ;;  %v1011_v36 = vadd.f32 %v2703_v21, %v2568_v32 }
 0x107   : > { %v1003_v34 = vadd.f32 %v2568_v32, %v1002_v23 }
 0x108   : > { %v2712_v40 = vpop.f32.mrb[4].mxu0 }
 0x109   : > { %v1223_v43 = vadd.f32 %v2712_v40, %v3319_v41  ;;  %v1214_v44 = vpop.f32.mrb[5].mxu0  ;;  %v2886_v40 = vld [vmem:[%s3698_s15] sm:$0xff]  }
 0x10a   : > { %v2713_v45 = vpop.f32.mrb[6].mxu0  ;;  %v1215_v19 = vadd.f32 %v3319_v41, %v1214_v44  ;;  %2718 = vmatprep.subr.bf16.mxu1 %v2886_v40 }
 0x10b   : > { %v2706_v24 = vpop.f32.mrb[4].mxu1  ;;  %v1247_v46 = vmul.f32 %v1223_v43, %v1223_v43  ;;  %v1226_v47 = vadd.f32 %v2713_v45, %v3319_v41  ;;  %v1217_v48 = vpop.f32.mrb[7].mxu0  ;;  %2719 = vmatpush3.bf16.msra.mxu1 %v2886_v40 }
 0x10c   : > { %v1604_v20 = vld [vmem:[#allocation2] sm:$0xf]  ;;  %v1015_v25 = vpop.f32.mrb[5].mxu1  ;;  %v1024_v39 = vadd.f32 %v2706_v24, %v2568_v32  ;;  %v1245_v21 = vmul.f32 %v1215_v19, %v1215_v19  ;;  %2734 = vmatprep.subr.bf16.mxu1 %v3034_v1 }
 0x10d   : > { %v2603_v22 = vcombine.low %v1604_v20, %v1604_v20  ;;  %v2707_v26 = vpop.f32.mrb[6].mxu1  ;;  %v1016_v37 = vadd.f32 %v2568_v32, %v1015_v25  ;;  %v1255_v49 = vmul.f32 %v1247_v46, %v1223_v43  ;;  %v1248_v50 = vmul.f32 %v1226_v47, %v1226_v47 }
 0x10e   : > { %v1018_v27 = vpop.f32.mrb[7].mxu1  ;;  %v1027_v42 = vadd.f32 %v2707_v26, %v2568_v32  ;;  %v1253_v23 = vmul.f32 %v1245_v21, %v1215_v19 }
 0x10f   : > { %1729 = vrot.lane.b32.xlu1 %v2603_v22, %s3037_s30  ;;  %v1019_v38 = vadd.f32 %v2568_v32, %v1018_v27  ;;  %v1263_v51 = vmul.f32 0.044715, %v1255_v49  ;;  %v1256_v52 = vmul.f32 %v1248_v50, %v1226_v47 }
 0x110   : > { %v1261_v25 = vmul.f32 0.044715, %v1253_v23 }
 0x111   : > { %v1271_v53 = vadd.f32 %v1263_v51, %v1223_v43  ;;  %v1264_v54 = vmul.f32 0.044715, %v1256_v52  ;;  %v3043_v51 = vmov 1983009808  }
 0x112   : > { %v1269_v27 = vadd.f32 %v1261_v25, %v1215_v19  ;;  %v1086_v52 = vunpack.c.l.s4 %v3043_v51 }
 0x113   : > { %v1279_v55 = vmul.f32 0.7978846, %v1271_v53  ;;  %v1272_v56 = vadd.f32 %v1264_v54, %v1226_v47  ;;  %v1088_v53 = vlaneseq }
 0x115   : > { %2900 = vtanh.f32 %v1279_v55  ;;  %v1280_v57 = vmul.f32 0.7978846, %v1272_v56  ;;  %v1087_v55 = vunpack.c.0.s8 %v1086_v52  ;;  %v1089_v56 = vshrl.u32 %v1088_v53, 7 }
 0x117   : > { %2902 = vtanh.f32 %v1280_v57  ;;  %v3044_v57 = vmov 1934713408  }
 0x11f   : > { %v2901_v58 = vpop.eup %2900 }
 0x120   : > { %v1295_v59 = vadd.f32 1.0, %v2901_v58  ;;  %v1119_v58 = vunpack.c.l.s4 %v3044_v57 }
 0x121   : > { %v2903_v60 = vpop.eup %2902 }
 0x122   : > { %v1303_v61 = vmul.f32 0.5, %v1295_v59  ;;  %v1296_v62 = vadd.f32 1.0, %v2903_v60 }
 0x124   : > { %v3323_v63 = vmul.f32 %v1303_v61, %v1223_v43  ;;  %v1304_v0 = vmul.f32 0.5, %v1296_v62  ;;  %v1090_v61 = vsub.s32 %v1087_v55, %v1089_v56 }
 0x126   : > { %v1312_v2 = vmul.f32 %v1304_v0, %v1226_v47 }
 0x128   : > { %v1318_v3 = vpack.c.bf16 %v1312_v2, %v3323_v63  ;;  %v1120_v63 = vunpack.c.0.s8 %v1119_v58 }
 0x177   : > { %v902_v28 = vpop.permute.xlu0 %901 }
 0x178   : > { %904 = vst.msk [vmem:[#allocation3] sm:$0xf] %vm896_vm3, %v902_v28 }
 0x17f   : > { %v1605_v29 = vld [vmem:[#allocation3] sm:$0xf] }
 0x180   : > { %v1614_v30 = vsel %vm1152_vm4, %v1605_v29, 0  ;;  %v2604_v31 = vcombine.low %v1605_v29, %v1605_v29  ;;  %v1277_v29 = vmul.f32 0.7978846, %v1269_v27 }
 0x181   : > { %2729 = vmatpush3.bf16.xpose.msra.mxu0 %v1614_v30  ;;  %v1730_v11 = vpop.permute.xlu1 %1729 }
 0x182   : > { %1734 = vrot.lane.b32.xlu0 %v2604_v31, %s3037_s30  ;;  %1853 = vrot.lane.b32.xlu1 %v2604_v31, %s3038_s1  ;;  %2904 = vtanh.f32 %v1277_v29 }
 0x183   : > { %2740 = vmatprep.subr.bf16.mxu0 %v3034_v1 }
 0x186   : > { %1851 = vrot.lane.b32.xlu0 %v2603_v22, %s3038_s1  ;;  %1969 = vrot.lane.b32.xlu1 %v2604_v31, %s3039_s29 }
 0x188   : > { %2731 = vmatmul.mubr.msk.bf16.vlgmr.msra.gmra.mrb[8].mxu0 %vm1152_vm4, %v1604_v20  ;;  %v1218_v20 = vadd.f32 %v3319_v41, %v1217_v48 }
 0x189   : > { %2742 = vmatprep.mubr.msk.bf16.mxu0 %vm3035_vm0, %v3034_v1 }
 0x18a   : > { %1967 = vrot.lane.b32.xlu0 %v2603_v22, %s3039_s29  ;;  %v1246_v22 = vmul.f32 %v1218_v20, %v1218_v20 }
 0x18c   : > { %v1254_v24 = vmul.f32 %v1246_v22, %v1218_v20  ;;  %v2905_v32 = vpop.eup %2904 }
 0x18e   : > { %v1262_v26 = vmul.f32 0.044715, %v1254_v24 }
 0x190   : > { %v1270_v28 = vadd.f32 %v1262_v26, %v1218_v20 }
 0x192   : > { %v1278_v30 = vmul.f32 0.7978846, %v1270_v28 }
 0x194   : > { %2906 = vtanh.f32 %v1278_v30  ;;  %v1662_v30 = vsub.s32 0, %v1089_v56 }
 0x1af   : > { %1030 = vxpose.xlu1.b32.start [1/8] (short) (narrow) %v1000_v33, 8  ;;  %v2907_v33 = vpop.eup %2906 }
 0x1b3   : > { %1031 = vxpose.xlu1.b32.cont [2/8] (short) (narrow) %v1003_v34, 8  ;;  %v1293_v34 = vadd.f32 1.0, %v2905_v32 }
 0x1b7   : > { %1032 = vxpose.xlu1.b32.cont [3/8] (short) (narrow) %v1008_v35, 8  ;;  %v1294_v35 = vadd.f32 1.0, %v2907_v33 }
 0x1bb   : > { %1033 = vxpose.xlu1.b32.cont [4/8] (short) (narrow) %v1011_v36, 8  ;;  %v1301_v36 = vmul.f32 0.5, %v1293_v34 }
 0x1bf   : > { %1034 = vxpose.xlu1.b32.cont [5/8] (short) (narrow) %v1016_v37, 8  ;;  %v1302_v37 = vmul.f32 0.5, %v1294_v35 }
 0x1c3   : > { %1035 = vxpose.xlu1.b32.cont [6/8] (short) (narrow) %v1019_v38, 8  ;;  %v1309_v38 = vmul.f32 %v1301_v36, %v1215_v19 }
 0x1c7   : > { %1036 = vxpose.xlu1.b32.cont [7/8] (short) (narrow) %v1024_v39, 8  ;;  %v1310_v39 = vmul.f32 %v1302_v37, %v1218_v20 }
 0x1cb   : > { %1037 = vxpose.xlu1.b32.end [8/8] (short) (narrow) %v1027_v42, 8  ;;  %v1317_v42 = vpack.c.bf16 %v1310_v39, %v1309_v38 }
 0x1cd   : > { %2720 = vmatprep.mubr.msk.bf16.mxu1 %vm952_vm2, %v1317_v42 }
 0x1ce   : > { %2721 = vmatmul.mubr.msk.bf16.vlgmr.msra.gmra.mrb[12].mxu1 %vm952_vm2, %v1318_v3 }
 0x1f4   : > { %v1735_v5 = vpop.permute.xlu0 %1734  ;;  %v1854_v12 = vpop.permute.xlu1 %1853 }
 0x1f5   : > { %v1740_v10 = vsel %vm1152_vm4, %v1735_v5, 0  ;;  %v1859_v13 = vsel %vm1152_vm4, %v1854_v12, 0 }
 0x1f6   : > { %2741 = vmatpush3.bf16.xpose.msra.mxu0 %v1740_v10 }
 0x1f7   : > { %2752 = vmatprep.subr.bf16.mxu0 %v3034_v1 }
 0x1f8   : > { %v1970_v14 = vpop.permute.xlu1 %1969  ;;  %v1852_v15 = vpop.permute.xlu0 %1851 }
 0x1f9   : > { %v1975_v17 = vsel %vm1152_vm4, %v1970_v14, 0 }
 0x1fc   : > { %v1968_v18 = vpop.permute.xlu0 %1967 }
 0x1fd   : > { %2743 = vmatmul.mubr.msk.bf16.vlgmr.msra.gmra.mrb[12].mxu0 %vm1152_vm4, %v1730_v11  ;;  %v1123_v11 = vsub.s32 %v1120_v63, %v1089_v56 }
 0x1fe   : > { %2753 = vmatpush3.bf16.xpose.msra.mxu0 %v1859_v13  ;;  %2754 = vmatprep.mubr.msk.bf16.mxu0 %vm3035_vm0, %v3034_v1 }
 0x1ff   : > { %2764 = vmatprep.subr.bf16.mxu0 %v3034_v1 }
 0x205   : > { %2755 = vmatmul.mubr.msk.bf16.vlgmr.msra.gmra.mrb[16].mxu0 %vm1152_vm4, %v1852_v15 }
 0x206   : > { %2765 = vmatpush3.bf16.xpose.msra.mxu0 %v1975_v17  ;;  %2766 = vmatprep.mubr.msk.bf16.mxu0 %vm3035_vm0, %v3034_v1 }
 0x207   : > { %2776 = vmatprep.subr.bf16.mxu0 %v3034_v1 }
 0x20d   : > { %2767 = vmatmul.mubr.msk.bf16.vlgmr.msra.gmra.mrb[20].mxu0 %vm1152_vm4, %v1968_v18 }
 0x20e   : > { %2780 = vmatprep.mubr.msk.bf16.mxu0 %vm3035_vm0, %v3034_v1 }
 0x22f   : > { %v1046_v31 = vpop.trf.xlu1 }
 0x230   : > { %1063 = vrot.lane.b32.xlu0 %v1046_v31, %s3037_s30 }
 0x234   : > { %1066 = vrot.lane.b32.xlu0 %v1046_v31, %s3038_s1 }
 0x238   : > { %1069 = vrot.lane.b32.xlu0 %v1046_v31, %s3039_s29 }
 0x23c   : > { %1072 = vrot.lane.b32.xlu0 %v1046_v31, %s3036_s0  ;;  %s3042_s0 = smov 72  }
 0x240   : > { %1075 = vrot.lane.b32.xlu0 %v1046_v31, %s3040_s27  ;;  %s810_s27 = scalar_lea.vmem %s3743_s6, %s3245_s5  ;;  %s780_s6 = sand.u32 1, %s3016_s26  }
 0x241   : > { %v1607_v19 = vld [vmem:[%s810_s27] sm:$0x1]  ;;  %s3046_s27 = smov 8  }
 0x242   : > { %v2600_v24 = vadd.f32 -1.0, %v1607_v19 }
 0x244   : > { %1078 = vrot.lane.b32.xlu0 %v1046_v31, %s3041_s7  ;;  %v1609_v29 = vmul.f32 1e+09, %v2600_v24  ;;  %s3045_s7 = smov 64  }
 0x246   : > { %v1663_v32 = vrot.slane %v1609_v29, %v1662_v30 }
 0x248   : > { %1081 = vrot.lane.b32.xlu0 %v1046_v31, %s3042_s0  ;;  %s3048_s0 = smov 24  }
 0x25b   : > { %v1650_v43 = vpop.f32.mrb[8].mxu0 }
 0x25c   : > { %v2732_v44 = vpop.f32.mrb[9].mxu0 }
 0x25d   : > { %v1653_v45 = vpop.f32.mrb[10].mxu0 }
 0x25e   : > { %v2733_v46 = vpop.f32.mrb[11].mxu0 }
 0x2a2   : > { %v1064_v47 = vpop.permute.xlu0 %1063 }
 0x2a6   : > { %v1067_v48 = vpop.permute.xlu0 %1066 }
 0x2a7   : > { %v1084_v62 = vcombine.low %v1046_v31, %v1067_v48  ;;  %v1656_v31 = vmul.f32 0.35355338, %v1650_v43 }
 0x2a9   : > { %v1091_v5 = vrot.slane %v1084_v62, %v1090_v61 }
 0x2aa   : > { %v1070_v49 = vpop.permute.xlu0 %1069 }
 0x2ab   : > { %v1092_v59 = vcombine.low %v1064_v47, %v1070_v49 }
 0x2ad   : > { %v1099_v0 = vrot.slane %v1092_v59, %v1090_v61 }
 0x2ae   : > { %v1073_v50 = vpop.permute.xlu0 %1072 }
 0x2af   : > { %v1116_v12 = vcombine.low %v1091_v5, %v1099_v0  ;;  %v1117_v13 = vcombine.high %v1091_v5, %v1099_v0 }
 0x2b1   : > { %v1124_v20 = vrot.slane %v1116_v12, %v1123_v11  ;;  %v1131_v21 = vrot.slane %v1117_v13, %v1123_v11  ;;  %v3383_v12 = vld [vmem:[%s3699_s16] ss:$0 sm:$0xff] }
 0x2b2   : > { %v1076_v54 = vpop.permute.xlu0 %1075 }
 0x2b6   : > { %v1079_v60 = vpop.permute.xlu0 %1078 }
 0x2b7   : > { %v1100_v2 = vcombine.low %v1073_v50, %v1079_v60 }
 0x2b9   : > { %v1107_v14 = vrot.slane %v1100_v2, %v1090_v61  ;;  %v2716_v2 = vpop.f32.mrb[8].mxu1 }
 0x2ba   : > { %v1082_v3 = vpop.permute.xlu0 %1081 }
 0x2bb   : > { %v1108_v10 = vcombine.low %v1076_v54, %v1082_v3  ;;  %v1230_v3 = vpop.f32.mrb[9].mxu1 }
 0x2bc   : > { %v2717_v5 = vpop.f32.mrb[10].mxu1 }
 0x2bd   : > { %v1115_v15 = vrot.slane %v1108_v10, %v1090_v61  ;;  %v1233_v10 = vpop.f32.mrb[11].mxu1 }
 0x2be   : > { %v1234_v24 = vadd.f32 %v3319_v41, %v1233_v10 }
 0x2bf   : > { %v1132_v17 = vcombine.low %v1107_v14, %v1115_v15  ;;  %v1133_v18 = vcombine.high %v1107_v14, %v1115_v15  ;;  %v1157_v15 = vunpack.c.l.bf16 %v3261_v6 }
 0x2c1   : > { %v1140_v22 = vrot.slane %v1132_v17, %v1123_v11  ;;  %v1147_v23 = vrot.slane %v1133_v18, %v1123_v11  ;;  %v3378_v11 = vpop.f32.mrb[12].mxu1  ;;  %v1158_v17 = vunpack.c.h.bf16 %v3261_v6  ;;  %v1250_v6 = vmul.f32 %v1234_v24, %v1234_v24 }
 0x2c2   : > { %v1382_v13 = vpop.f32.mrb[13].mxu1 }
 0x2c3   : > { %v1148_v25 = vcombine.low %v1124_v20, %v1140_v22  ;;  %v1149_v26 = vcombine.high %v1124_v20, %v1140_v22  ;;  %v1150_v27 = vcombine.low %v1131_v21, %v1147_v23  ;;  %v1151_v28 = vcombine.high %v1131_v21, %v1147_v23  ;;  %v3385_v14 = vpop.f32.mrb[14].mxu1 }
 0x2c4   : > { %v1385_v18 = vpop.f32.mrb[15].mxu1  ;;  %v1239_v22 = vadd.f32 %v2716_v2, %v3319_v41  ;;  %v1231_v23 = vadd.f32 %v3319_v41, %v1230_v3 }
 0x2c5   : > { %1153 = vst.msk [vmem:[#allocation5] sm:$0xff] %vm1152_vm4, %v1148_v25  ;;  %1154 = vst.msk [vmem:[#allocation5 + $0x8] sm:$0xff] %vm1152_vm4, %v1149_v26  ;;  %v1386_v19 = vadd.f32 %v3383_v12, %v1385_v18  ;;  %v1242_v25 = vadd.f32 %v2717_v5, %v3319_v41 }
 0x2c6   : > { %1155 = vst.msk [vmem:[#allocation5 + $0x10] sm:$0xff] %vm1152_vm4, %v1150_v27  ;;  %1156 = vst.msk [vmem:[#allocation5 + $0x18] sm:$0xff] %vm1152_vm4, %v1151_v28  ;;  %v1251_v26 = vmul.f32 %v1239_v22, %v1239_v22  ;;  %v1249_v27 = vmul.f32 %v1231_v23, %v1231_v23 }
 0x2c7   : > { %v3393_v21 = vadd.f32 %v1386_v19, %v1158_v17  ;;  %v1252_v28 = vmul.f32 %v1242_v25, %v1242_v25 }
 0x2c8   : > { %v1259_v29 = vmul.f32 %v1251_v26, %v1239_v22  ;;  %v1257_v30 = vmul.f32 %v1249_v27, %v1231_v23 }
 0x2cc   : > { %v1657_v33 = vld [vmem:[#allocation5] sm:$0xff]  ;;  %v1784_v40 = vld [vmem:[#allocation5 + $0x8] sm:$0xff] }
 0x2cd   : > { %v1658_v34 = vadd.f32 %v1657_v33, %v1656_v31  ;;  %v1903_v50 = vld [vmem:[#allocation5 + $0x10] sm:$0xff]  ;;  %v2019_v59 = vld [vmem:[#allocation5 + $0x18] sm:$0xff]  ;;  %v1258_v31 = vmul.f32 %v1250_v6, %v1234_v24  ;;  %v1267_v33 = vmul.f32 0.044715, %v1259_v29 }
 0x2cf   : > { %v3361_v35 = vadd.f32 %v1663_v32, %v1658_v34  ;;  %v1265_v34 = vmul.f32 0.044715, %v1257_v30 }
 0x2d0   : > { %v1776_v36 = vpop.f32.mrb[12].mxu0 }
 0x2d1   : > { %v1782_v37 = vmul.f32 0.35355338, %v1776_v36  ;;  %v2744_v38 = vpop.f32.mrb[13].mxu0  ;;  %v1666_v39 = vsel %vm1152_vm4, %v3361_v35, -inf  ;;  %v1266_v36 = vmul.f32 0.044715, %v1258_v31 }
 0x2d2   : > { %1667 = vmax.xlane.f32.xlu0 %v1666_v39  ;;  %v1779_v42 = vpop.f32.mrb[14].mxu0 }
 0x2d3   : > { %v1785_v44 = vadd.f32 %v1784_v40, %v1782_v37  ;;  %v2745_v45 = vpop.f32.mrb[15].mxu0  ;;  %v1275_v40 = vadd.f32 %v1267_v33, %v1239_v22  ;;  %v1273_v42 = vadd.f32 %v1265_v34, %v1231_v23 }
 0x2d4   : > { %v1274_v45 = vadd.f32 %v1266_v36, %v1234_v24 }
 0x2d5   : > { %v3365_v46 = vadd.f32 %v1785_v44, %v1663_v32 }
 0x2d7   : > { %v1787_v43 = vsel %vm1152_vm4, %v3365_v46, -inf }
 0x2d8   : > { %1788 = vmax.xlane.f32.xlu0 %v1787_v43  ;;  %v1895_v47 = vpop.f32.mrb[16].mxu0  ;;  %v1283_v43 = vmul.f32 0.7978846, %v1275_v40 }
 0x2d9   : > { %v1901_v48 = vmul.f32 0.35355338, %v1895_v47  ;;  %v2756_v49 = vpop.f32.mrb[17].mxu0  ;;  %v1281_v47 = vmul.f32 0.7978846, %v1273_v42 }
 0x2da   : > { %v1898_v51 = vpop.f32.mrb[18].mxu0 }
 0x2db   : > { %v1904_v52 = vadd.f32 %v1903_v50, %v1901_v48  ;;  %v2757_v53 = vpop.f32.mrb[19].mxu0  ;;  %v1282_v48 = vmul.f32 0.7978846, %v1274_v45 }
 0x2dd   : > { %v3369_v54 = vadd.f32 %v1904_v52, %v1663_v32 }
 0x2df   : > { %v1906_v55 = vsel %vm1152_vm4, %v3369_v54, -inf }
 0x2e0   : > { %1907 = vmax.xlane.f32.xlu0 %v1906_v55  ;;  %v2011_v56 = vpop.f32.mrb[20].mxu0 }
 0x2e1   : > { %v2017_v57 = vmul.f32 0.35355338, %v2011_v56  ;;  %v2768_v58 = vpop.f32.mrb[21].mxu0 }
 0x2e2   : > { %v2014_v60 = vpop.f32.mrb[22].mxu0 }
 0x2e3   : > { %v2020_v61 = vadd.f32 %v2019_v59, %v2017_v57  ;;  %v2769_v62 = vpop.f32.mrb[23].mxu0 }
 0x2e5   : > { %v3373_v63 = vadd.f32 %v2020_v61, %v1663_v32  ;;  %v1260_v32 = vmul.f32 %v1252_v28, %v1242_v25 }
 0x2e7   : > { %v2022_v0 = vsel %vm1152_vm4, %v3373_v63, -inf  ;;  %v1268_v38 = vmul.f32 0.044715, %v1260_v32 }
 0x2e8   : > { %2023 = vmax.xlane.f32.xlu1 %v2022_v0 }
 0x2e9   : > { %v1276_v41 = vadd.f32 %v1268_v38, %v1242_v25 }
 0x2eb   : > { %v1284_v49 = vmul.f32 0.7978846, %v1276_v41 }
 0x2f6   : > { %905 = vrot.lane.b32.xlu0 %v3295_v16, %s3045_s7  ;;  %v1383_v16 = vadd.f32 %v3383_v12, %v1382_v13  ;;  %s3047_s7 = smov 16  }
 0x2f8   : > { %v3391_v20 = vadd.f32 %v1383_v16, %v1157_v15 }
 0x35f   : > { %v1668_v37 = vpop.xlane.xlu0 %1667 }
 0x360   : > { %v1669_v39 = vsub.f32 %v3361_v35, %v1668_v37 }
 0x362   : > { %v1670_v44 = vmul.f32 1.442695, %v1669_v39 }
 0x364   : > { %2908 = vpow2.f32 %v1670_v44 }
 0x365   : > { %2910 = vtanh.f32 %v1283_v43  ;;  %v1789_v50 = vpop.xlane.xlu0 %1788 }
 0x366   : > { %2912 = vtanh.f32 %v1281_v47  ;;  %v1790_v6 = vsub.f32 %v3365_v46, %v1789_v50 }
 0x367   : > { %2914 = vtanh.f32 %v1282_v48 }
 0x368   : > { %2916 = vtanh.f32 %v1284_v49  ;;  %v1791_v28 = vmul.f32 1.442695, %v1790_v6 }
 0x36a   : > { %2918 = vpow2.f32 %v1791_v28 }
 0x36d   : > { %v1908_v51 = vpop.xlane.xlu0 %1907 }
 0x36e   : > { %v2909_v52 = vpop.eup %2908  ;;  %v1909_v29 = vsub.f32 %v3369_v54, %v1908_v51 }
 0x36f   : > { %v1672_v53 = vsel %vm1152_vm4, %v2909_v52, 0.0  ;;  %v2911_v55 = vpop.eup %2910 }
 0x370   : > { %1673 = vadd.xlane.f32.xlu0 %v1672_v53  ;;  %v2913_v56 = vpop.eup %2912  ;;  %v1299_v61 = vadd.f32 1.0, %v2911_v55 }
 0x371   : > { %v906_v35 = vpop.permute.xlu0 %905  ;;  %v2915_v57 = vpop.eup %2914  ;;  %v1297_v59 = vadd.f32 1.0, %v2913_v56 }
 0x372   : > { %908 = vst.msk [vmem:[#allocation4] sm:$0xf] %vm896_vm3, %v906_v35  ;;  %v2917_v58 = vpop.eup %2916  ;;  %v1298_v60 = vadd.f32 1.0, %v2915_v57  ;;  %v1307_v13 = vmul.f32 0.5, %v1299_v61 }
 0x373   : > { %v1300_v62 = vadd.f32 1.0, %v2917_v58  ;;  %v1305_v5 = vmul.f32 0.5, %v1297_v59 }
 0x374   : > { %v1306_v10 = vmul.f32 0.5, %v1298_v60  ;;  %v1315_v18 = vmul.f32 %v1307_v13, %v1239_v22  ;;  %v1910_v22 = vmul.f32 1.442695, %v1909_v29  ;;  %v2919_v30 = vpop.eup %2918 }
 0x375   : > { %v1308_v15 = vmul.f32 0.5, %v1300_v62  ;;  %v1313_v17 = vmul.f32 %v1305_v5, %v1231_v23  ;;  %v2024_v23 = vpop.xlane.xlu1 %2023  ;;  %v1793_v31 = vsel %vm1152_vm4, %v2919_v30, 0.0 }
 0x376   : > { %v1314_v16 = vmul.f32 %v1306_v10, %v1234_v24  ;;  %v2025_v24 = vsub.f32 %v3373_v63, %v2024_v23  ;;  %2920 = vpow2.f32 %v1910_v22 }
 0x377   : > { %v1316_v19 = vmul.f32 %v1308_v15, %v1242_v25 }
 0x378   : > { %v1319_v26 = vpack.c.bf16 %v1314_v16, %v1313_v17  ;;  %v2026_v25 = vmul.f32 1.442695, %v2025_v24 }
 0x379   : > { %v1606_v0 = vld [vmem:[#allocation4] sm:$0xf]  ;;  %v1320_v27 = vpack.c.bf16 %v1316_v19, %v1315_v18 }
 0x37a   : > { %v1683_v2 = vsel %vm1681_vm5, %v1606_v0, 0  ;;  %v2606_v3 = vcombine.low %v1606_v0, %v1606_v0  ;;  %2724 = vmatprep.mubr.msk.bf16.mxu1 %vm952_vm2, %v1319_v26  ;;  %2922 = vpow2.f32 %v2026_v25 }
 0x37b   : > { %2735 = vmatpush3.bf16.msra.mxu1 %v1683_v2 }
 0x37c   : > { %1802 = vrot.lane.b32.xlu1 %v2606_v3, %s3037_s30  ;;  %2746 = vmatprep.subr.bf16.mxu1 %v3034_v1  ;;  %s3569_s30 = scalar_lea.vmem %s3707_s24, %s2634_s25  ;;  %s2631_s25 = sshll.u32 %s3024_s28, 7 }
 0x37d   : > { %2725 = vmatmul.mubr.msk.bf16.gmra.mrb[16].mxu1 %vm952_vm2, %v1320_v27  ;;  %s3049_s28 = smov [#allocation6]  }
 0x37e   : > { %2736 = vmatprep.mubr.msk.bf16.mxu1 %vm3035_vm0, %v3034_v1 }
 0x380   : > { %v2921_v32 = vpop.eup %2920 }
 0x381   : > { %v1912_v33 = vsel %vm1152_vm4, %v2921_v32, 0.0 }
 0x384   : > { %v2923_v34 = vpop.eup %2922 }
 0x385   : > { %v2028_v46 = vsel %vm1152_vm4, %v2923_v34, 0.0 }
 0x386   : > { %1918 = vrot.lane.b32.xlu0 %v2606_v3, %s3038_s1  ;;  %s3745_s1 = sld [smem:[#allocation20_spill]] }
 0x3a0   : > { %1794 = vadd.xlane.f32.xlu1 %v1793_v31 }
 0x3a4   : > { %1913 = vadd.xlane.f32.xlu1 %v1912_v33 }
 0x3a8   : > { %2029 = vadd.xlane.f32.xlu1 %v2028_v46 }
 0x3b9   : > { %2034 = vrot.lane.b32.xlu1 %v2606_v3, %s3039_s29  ;;  %s3744_s29 = sld [smem:[#allocation19_spill]] }
 0x3bf   : > { %v2888_v3 = vld [vmem:[%s3744_s29] sm:$0xff]   ;;  %v2889_v10 = vld [vmem:[%s3744_s29 + $0x8] sm:$0xff]  }
 0x3c0   : > { %2777 = vmatpush3.bf16.msra.mxu0 %v2888_v3 }
 0x3c1   : > { %2778 = vmatprep.subr.bf16.mxu0 %v3034_v1 }
 0x3c4   : > { %2779 = vmatpush3.bf16.msra.mxu0 %v2889_v10 }
 0x3c5   : > { %2792 = vmatprep.subr.bf16.mxu0 %v3034_v1 }
 0x3ee   : > { %v1803_v37 = vpop.permute.xlu1 %1802 }
 0x3ef   : > { %v1808_v39 = vsel %vm1681_vm5, %v1803_v37, 0 }
 0x3fd   : > { %v1674_v54 = vpop.xlane.xlu0 %1673 }
 0x3fe   : > { %2924 = vrcp.f32 %v1674_v54  ;;  %v2612_v54 = vld [vmem:[%s3745_s1] ss:$0 sm:$0xff] }
 0x401   : > { %v1919_v43 = vpop.permute.xlu0 %1918 }
 0x402   : > { %v1924_v49 = vsel %vm1681_vm5, %v1919_v43, 0 }
 0x408   : > { %v2925_v63 = vpop.eup %2924 }
 0x409   : > { %v1676_v36 = vmul.f32 %v2925_v63, %v2909_v52 }
 0x40b   : > { %v1677_v38 = vpack.c.bf16 %v1676_v36, %v1676_v36  ;;  %v1391_v36 = vadd.f32 %v3378_v11, %v3383_v12 }
 0x40d   : > { %2737 = vmatmul.mubr.msk.bf16.vlgmr.msra.gmra.mrb[20].mxu1 %vm1152_vm4, %v1677_v38 }
 0x40e   : > { %2747 = vmatpush3.bf16.msra.mxu1 %v1808_v39  ;;  %2748 = vmatprep.mubr.msk.bf16.mxu1 %vm3035_vm0, %v3034_v1  ;;  %v1159_v39 = vunpack.c.l.bf16 %v3263_v7 }
 0x40f   : > { %2758 = vmatprep.subr.bf16.mxu1 %v3034_v1 }
 0x410   : > { %v1415_v43 = vadd.f32 %v1391_v36, %v1159_v39  ;;  %v2617_v36 = vld [vmem:[%s3701_s18] ss:$0 sm:$0xff] }
 0x412   : > { %v1429_v11 = vsel %vm952_vm2, %v1415_v43, 0.0 }
 0x42d   : > { %v1795_v40 = vpop.xlane.xlu1 %1794 }
 0x42e   : > { %2926 = vrcp.f32 %v1795_v40 }
 0x431   : > { %v1914_v42 = vpop.xlane.xlu1 %1913 }
 0x432   : > { %2928 = vrcp.f32 %v1914_v42 }
 0x435   : > { %v2030_v44 = vpop.xlane.xlu1 %2029 }
 0x436   : > { %2930 = vrcp.f32 %v2030_v44 }
 0x438   : > { %v2927_v45 = vpop.eup %2926 }
 0x439   : > { %v1797_v41 = vmul.f32 %v2927_v45, %v2919_v30  ;;  %v2035_v51 = vpop.permute.xlu1 %2034 }
 0x43a   : > { %v2040_v35 = vsel %vm1681_vm5, %v2035_v51, 0 }
 0x43b   : > { %v1798_v47 = vpack.c.bf16 %v1797_v41, %v1797_v41 }
 0x43c   : > { %v2929_v48 = vpop.eup %2928 }
 0x43d   : > { %2749 = vmatmul.mubr.msk.bf16.vlgmr.msra.gmra.mrb[24].mxu1 %vm1152_vm4, %v1798_v47  ;;  %v1916_v50 = vmul.f32 %v2929_v48, %v2921_v32  ;;  %v1161_v47 = vunpack.c.l.bf16 %v3265_v8 }
 0x43e   : > { %2759 = vmatpush3.bf16.msra.mxu1 %v1924_v49  ;;  %2760 = vmatprep.mubr.msk.bf16.mxu1 %vm3035_vm0, %v3034_v1 }
 0x43f   : > { %2770 = vmatprep.subr.bf16.mxu1 %v3034_v1  ;;  %v1917_v52 = vpack.c.bf16 %v1916_v50, %v1916_v50  ;;  %v1163_v50 = vunpack.c.l.bf16 %v3276_v9 }
 0x440   : > { %v2931_v53 = vpop.eup %2930 }
 0x441   : > { %v2032_v55 = vmul.f32 %v2931_v53, %v2923_v34 }
 0x443   : > { %v2033_v56 = vpack.c.bf16 %v2032_v55, %v2032_v55 }
 0x445   : > { %2761 = vmatmul.mubr.msk.bf16.vlgmr.msra.gmra.mrb[28].mxu1 %vm1152_vm4, %v1917_v52 }
 0x446   : > { %2771 = vmatpush3.bf16.msra.mxu1 %v2040_v35  ;;  %2772 = vmatprep.mubr.msk.bf16.mxu1 %vm3035_vm0, %v3034_v1 }
 0x447   : > { %2784 = vmatprep.subr.bf16.mxu1 %v3034_v1 }
 0x44d   : > { %2773 = vmatmul.mubr.msk.bf16.vlgmr.msra.gmra.mrb[32].mxu1 %vm1152_vm4, %v2033_v56 }
 0x44e   : > { %2788 = vmatprep.mubr.msk.bf16.mxu1 %vm3035_vm0, %v3034_v1 }
 0x450   : > { %v2726_v57 = vpop.f32.mrb[16].mxu1 }
 0x451   : > { %v1398_v58 = vpop.f32.mrb[17].mxu1  ;;  %v1407_v48 = vadd.f32 %v2726_v57, %v3383_v12  ;;  %v1394_v57 = vadd.f32 %v3385_v14, %v3383_v12 }
 0x452   : > { %v3435_v59 = vpop.f32.mrb[18].mxu1  ;;  %v1399_v45 = vadd.f32 %v3383_v12, %v1398_v58 }
 0x453   : > { %v3437_v60 = vpop.f32.mrb[19].mxu1  ;;  %v1419_v52 = vadd.f32 %v1407_v48, %v1163_v50  ;;  %v1410_v14 = vadd.f32 %v3435_v59, %v3383_v12  ;;  %v2895_v48 = vld [vmem:[%s3747_s11 + $0x18] sm:$0xff]  }
 0x454   : > { %v1417_v49 = vadd.f32 %v1399_v45, %v1161_v47  ;;  %v2892_v45 = vld [vmem:[%s3747_s11] sm:$0xff]   ;;  %v2894_v47 = vld [vmem:[%s3747_s11 + $0x10] sm:$0xff]  }
 0x456   : > { %v1435_v51 = vsel %vm952_vm2, %v1417_v49, 0.0 }
 0x4e0   : > { %v1719_v61 = vpop.f32.mrb[20].mxu1 }
 0x4e1   : > { %v2738_v62 = vpop.f32.mrb[21].mxu1  ;;  %v1725_v30 = vpack.c.bf16 %v1719_v61, %v1719_v61  ;;  %v1423_v61 = vsel %vm952_vm2, %v3391_v20, 0.0 }
 0x4e2   : > { %v1722_v0 = vpop.f32.mrb[22].mxu1  ;;  %v1160_v62 = vunpack.c.h.bf16 %v3263_v7  ;;  %v1164_v7 = vunpack.c.h.bf16 %v3276_v9  ;;  %v2891_v9 = vld [vmem:[%s3746_s9 + $0x8] sm:$0xff]  }
 0x4e3   : > { %v2739_v2 = vpop.f32.mrb[23].mxu1  ;;  %v1402_v0 = vadd.f32 %v3383_v12, %v3437_v60  ;;  %v2890_v12 = vld [vmem:[%s3746_s9] sm:$0xff]  }
 0x4e4   : > { %v1426_v2 = vsel %vm952_vm2, %v3393_v21, 0.0  ;;  %v3477_v3 = vadd.f32 %v1394_v57, %v1160_v62  ;;  %2785 = vmatpush3.bf16.msra.mxu1 %v2890_v12 }
 0x4e5   : > { %2786 = vmatprep.subr.bf16.mxu1 %v3034_v1 }
 0x4e6   : > { %v1432_v10 = vsel %vm952_vm2, %v3477_v3, 0.0 }
 0x4e8   : > { %2787 = vmatpush3.bf16.msra.mxu1 %v2891_v9 }
 0x510   : > { %v1844_v5 = vpop.f32.mrb[24].mxu1 }
 0x511   : > { %v1850_v13 = vpack.c.bf16 %v1844_v5, %v1844_v5  ;;  %v2750_v15 = vpop.f32.mrb[25].mxu1  ;;  %v1162_v5 = vunpack.c.h.bf16 %v3265_v8 }
 0x512   : > { %v1847_v17 = vpop.f32.mrb[26].mxu1  ;;  %v3489_v15 = vadd.f32 %v1410_v14, %v1164_v7  ;;  %v3559_v14 = vld [vmem:[%s3705_s22] ss:$0 sm:$0xff] }
 0x513   : > { %2084 = vrot.lane.b32.xlu1 %v1850_v13, %s3046_s27  ;;  %v2751_v16 = vpop.f32.mrb[27].mxu1  ;;  %v3484_v13 = vadd.f32 %v1402_v0, %v1162_v5  ;;  %v3554_v0 = vld [vmem:[%s3704_s21] ss:$0 sm:$0xff]  ;;  %s2557_s27 = sshll.u32 %s780_s6, 3 }
 0x514   : > { %v1444_v8 = vsel %vm952_vm2, %v3489_v15, 0.0  ;;  %s782_s1 = scalar_lea.vmem [#allocation6], %s2557_s27  ;;  %s2958_s27 = sshll.u32 %s3049_s28, 4  ;;  %s2959_s27 = int_to_ptr.vmem [resolvable:$false] %s2958_s27 }
 0x515   : > { %v1438_v60 = vsel %vm952_vm2, %v3484_v13, 0.0  ;;  %s2960_s4 = scalar_lea.vmem %s2959_s27, 256 }
 0x518   : > { %v1960_v18 = vpop.f32.mrb[28].mxu1 }
 0x519   : > { %v1966_v19 = vpack.c.bf16 %v1960_v18, %v1960_v18  ;;  %v2762_v26 = vpop.f32.mrb[29].mxu1 }
 0x51a   : > { %v1963_v27 = vpop.f32.mrb[30].mxu1 }
 0x51b   : > { %2087 = vrot.lane.b32.xlu1 %v1966_v19, %s3047_s7  ;;  %v2763_v6 = vpop.f32.mrb[31].mxu1  ;;  %s2389_s7 = scalar_lea.sflag [#allocation7], %s780_s6 }
 0x520   : > { %v2076_v28 = vpop.f32.mrb[32].mxu1 }
 0x521   : > { %v2082_v29 = vpack.c.bf16 %v2076_v28, %v2076_v28  ;;  %v2774_v23 = vpop.f32.mrb[33].mxu1 }
 0x522   : > { %v2079_v22 = vpop.f32.mrb[34].mxu1 }
 0x523   : > { %2090 = vrot.lane.b32.xlu0 %v2082_v29, %s3048_s0  ;;  %v2775_v24 = vpop.f32.mrb[35].mxu1 }
 0x585   : > { %v2085_v25 = vpop.permute.xlu1 %2084 }
 0x586   : > { %v2094_v32 = vsel %vm1152_vm4, %v1725_v30, %v2085_v25 }
 0x58d   : > { %v2088_v31 = vpop.permute.xlu1 %2087 }
 0x58e   : > { %v2096_v33 = vsel %vm952_vm2, %v2094_v32, %v2088_v31 }
 0x595   : > { %v2091_v34 = vpop.permute.xlu0 %2090 }
 0x596   : > { %v2099_v46 = vsel %vm2097_vm6, %v2096_v33, %v2091_v34 }
 0x597   : > { %2781 = vmatmul.mubr.msk.bf16.vlgmr.msra.gmra.mrb[24].mxu0 %vm851_vm1, %v2099_v46  ;;  %v2616_v46 = vld [vmem:[%s3700_s17] ss:$0 sm:$0xff] }
 0x598   : > { %2800 = vmatprep.mubr.msk.bf16.mxu0 %vm3035_vm0, %v3034_v1  ;;  %2793 = vmatpush3.bf16.msra.mxu0 %v2892_v45  ;;  %v2622_v45 = vld [vmem:[%s3695_s12] ss:$0 sm:$0xff] }
 0x599   : > { %2794 = vmatprep.subr.bf16.mxu0 %v3034_v1 }
 0x66a   : > { %v2160_v63 = vpop.f32.mrb[24].mxu0 }
 0x66b   : > { %v2161_v37 = vadd.f32 %v2612_v54, %v2160_v63  ;;  %v2782_v38 = vpop.f32.mrb[25].mxu0 }
 0x66c   : > { %v2163_v40 = vpop.f32.mrb[26].mxu0 }
 0x66d   : > { %v2783_v42 = vpop.f32.mrb[27].mxu0  ;;  %v2166_v44 = vadd.f32 %v2161_v37, %v3252_v4  ;;  %v1441_v4 = vsel %vm952_vm2, %v1419_v52, 0.0 }
 0x66f   : > { %v2169_v41 = vsel %vm851_vm1, %v2166_v44, 0.0 }
 0x670   : > { %2170 = vadd.xlane.f32.xlu1 %v2169_v41  ;;  %v2893_v41 = vld [vmem:[%s3747_s11 + $0x8] sm:$0xff]  }
 0x671   : > { %2795 = vmatpush3.bf16.msra.mxu0 %v2893_v41 }
 0x672   : > { %2796 = vmatprep.subr.bf16.mxu0 %v3034_v1 }
 0x674   : > { %1430 = vadd.xlane.f32.xlu1 %v1429_v11 }
 0x675   : > { %2797 = vmatpush3.bf16.msra.mxu0 %v2894_v47 }
 0x676   : > { %2798 = vmatprep.subr.bf16.mxu0 %v3034_v1 }
 0x678   : > { %1436 = vadd.xlane.f32.xlu1 %v1435_v51 }
 0x679   : > { %2799 = vmatpush3.bf16.msra.mxu0 %v2895_v48 }
 0x67c   : > { %1442 = vadd.xlane.f32.xlu1 %v1441_v4 }
 0x6fd   : > { %v2171_v53 = vpop.xlane.xlu1 %2170 }
 0x6fe   : > { %v2173_v35 = vmul.f32 0.03125, %v2171_v53 }
 0x700   : > { %v2174_v55 = vsub.f32 %v2166_v44, %v2173_v35 }
 0x701   : > { %v1431_v59 = vpop.xlane.xlu1 %1430 }
 0x702   : > { %v2175_v56 = vmul.f32 %v2174_v55, %v2174_v55  ;;  %v1450_v19 = vmul.f32 0.0625, %v1431_v59 }
 0x704   : > { %v2176_v58 = vsel %vm851_vm1, %v2175_v56, 0.0  ;;  %v3500_v28 = vsub.f32 %v1415_v43, %v1450_v19 }
 0x705   : > { %2177 = vadd.xlane.f32.xlu0 %v2176_v58  ;;  %v1437_v18 = vpop.xlane.xlu1 %1436 }
 0x706   : > { %v1452_v29 = vmul.f32 0.0625, %v1437_v18  ;;  %v1466_v32 = vmul.f32 %v3500_v28, %v3500_v28 }
 0x708   : > { %v3503_v25 = vsub.f32 %v1417_v49, %v1452_v29 }
 0x709   : > { %1424 = vadd.xlane.f32.xlu0 %v1423_v61  ;;  %v1443_v22 = vpop.xlane.xlu1 %1442 }
 0x70a   : > { %v1454_v30 = vmul.f32 0.0625, %v1443_v22  ;;  %v1468_v54 = vmul.f32 %v3503_v25, %v3503_v25 }
 0x70c   : > { %v3508_v34 = vsub.f32 %v1419_v52, %v1454_v30  ;;  %v1484_v38 = vsel %vm952_vm2, %v1468_v54, 0.0 }
 0x70d   : > { %1427 = vadd.xlane.f32.xlu0 %v1426_v2 }
 0x70e   : > { %v1470_v39 = vmul.f32 %v3508_v34, %v3508_v34 }
 0x710   : > { %v1490_v44 = vsel %vm952_vm2, %v1470_v39, 0.0 }
 0x711   : > { %1433 = vadd.xlane.f32.xlu0 %v1432_v10 }
 0x715   : > { %1439 = vadd.xlane.f32.xlu0 %v1438_v60 }
 0x719   : > { %1445 = vadd.xlane.f32.xlu0 %v1444_v8 }
 0x792   : > { %v2178_v17 = vpop.xlane.xlu0 %2177 }
 0x793   : > { %v2179_v16 = vmul.f32 0.03125, %v2178_v17 }
 0x795   : > { %v2180_v26 = vadd.f32 1e-05, %v2179_v16 }
 0x796   : > { %v1425_v27 = vpop.xlane.xlu0 %1424 }
 0x797   : > { %2932 = vrsqrt.f32 %v2180_v26  ;;  %v1448_v6 = vmul.f32 0.0625, %v1425_v27 }
 0x799   : > { %v1456_v23 = vsub.f32 %v3391_v20, %v1448_v6  ;;  %v1478_v20 = vsel %vm952_vm2, %v1466_v32, 0.0 }
 0x79a   : > { %v3536_v43 = vpop.xlane.xlu0 %1427 }
 0x79b   : > { %v1464_v24 = vmul.f32 %v1456_v23, %v1456_v23 }
 0x79d   : > { %v1472_v31 = vsel %vm952_vm2, %v1464_v24, 0.0  ;;  %v2618_v24 = vld [vmem:[%s3748_s10] ss:$0 sm:$0xff]  ;;  %s3749_s10 = sld [smem:[#allocation26_spill]] }
 0x79e   : > { %1473 = vadd.xlane.f32.xlu0 %v1472_v31  ;;  %v3545_v11 = vpop.xlane.xlu0 %1433 }
 0x79f   : > { %v1451_v48 = vmul.f32 0.0625, %v3545_v11 }
 0x7a1   : > { %v2933_v33 = vpop.eup %2932 }
 0x7a2   : > { %v2182_v63 = vmul.f32 %v2933_v33, %v2174_v55  ;;  %1479 = vadd.xlane.f32.xlu0 %v1478_v20  ;;  %v3547_v49 = vpop.xlane.xlu0 %1439 }
 0x7a3   : > { %s3635_s11 = scalar_lea.hbm %s3749_s10, %s2631_s25 }
 0x7a4   : > { %v2189_v37 = vmul.f32 %v2616_v46, %v2182_v63 }
 0x7a6   : > { %1485 = vadd.xlane.f32.xlu0 %v1484_v38  ;;  %v3522_v40 = vadd.f32 %v2617_v36, %v2189_v37  ;;  %v3549_v50 = vpop.xlane.xlu0 %1445 }
 0x7a8   : > { %v2197_v42 = vpack.c.bf16 %v3522_v40, %v3522_v40 }
 0x7aa   : > { %2789 = vmatmul.mubr.msk.bf16.vlgmr.msra.gmra.mrb[36].mxu1 %vm851_vm1, %v2197_v42  ;;  %1491 = vadd.xlane.f32.xlu0 %v1490_v44  ;;  %v1449_v44 = vmul.f32 0.0625, %v3536_v43 }
 0x7ac   : > { %v1457_v47 = vsub.f32 %v3393_v21, %v1449_v44  ;;  %v1455_v21 = vmul.f32 0.0625, %v3549_v50 }
 0x82b   : > { %v1474_v51 = vpop.xlane.xlu0 %1473 }
 0x82c   : > { %v1496_v52 = vmul.f32 0.0625, %v1474_v51 }
 0x82e   : > { %v1504_v4 = vadd.f32 1e-05, %v1496_v52 }
 0x82f   : > { %v1480_v53 = vpop.xlane.xlu0 %1479 }
 0x830   : > { %2934 = vrsqrt.f32 %v1504_v4  ;;  %v1498_v35 = vmul.f32 0.0625, %v1480_v53 }
 0x832   : > { %v1506_v55 = vadd.f32 1e-05, %v1498_v35 }
 0x833   : > { %v1486_v56 = vpop.xlane.xlu0 %1485 }
 0x834   : > { %2936 = vrsqrt.f32 %v1506_v55  ;;  %v1500_v1 = vmul.f32 0.0625, %v1486_v56  ;;  %v1459_v55 = vsub.f32 %v3477_v3, %v1451_v48  ;;  %v1453_v56 = vmul.f32 0.0625, %v3547_v49 }
 0x836   : > { %v1508_v58 = vadd.f32 1e-05, %v1500_v1  ;;  %v1465_v1 = vmul.f32 %v1457_v47, %v1457_v47 }
 0x837   : > { %v1492_v57 = vpop.xlane.xlu0 %1491 }
 0x838   : > { %2938 = vrsqrt.f32 %v1508_v58  ;;  %v1502_v61 = vmul.f32 0.0625, %v1492_v57  ;;  %v1461_v58 = vsub.f32 %v3484_v13, %v1453_v56  ;;  %v1475_v11 = vsel %vm952_vm2, %v1465_v1, 0.0 }
 0x839   : > { %v1467_v57 = vmul.f32 %v1459_v55, %v1459_v55 }
 0x83a   : > { %v2935_v62 = vpop.eup %2934  ;;  %v1510_v2 = vadd.f32 1e-05, %v1502_v61  ;;  %v1463_v61 = vsub.f32 %v3489_v15, %v1455_v21 }
 0x83b   : > { %v1520_v5 = vmul.f32 %v2935_v62, %v1456_v23  ;;  %v1469_v62 = vmul.f32 %v1461_v58, %v1461_v58 }
 0x83c   : > { %2940 = vrsqrt.f32 %v1510_v2  ;;  %v1471_v49 = vmul.f32 %v1463_v61, %v1463_v61 }
 0x83d   : > { %v1534_v10 = vmul.f32 %v3554_v0, %v1520_v5  ;;  %v1487_v3 = vsel %vm952_vm2, %v1469_v62, 0.0 }
 0x83e   : > { %v2937_v7 = vpop.eup %2936  ;;  %v1493_v2 = vsel %vm952_vm2, %v1471_v49, 0.0 }
 0x83f   : > { %v1548_v60 = vadd.f32 %v3559_v14, %v1534_v10  ;;  %v1522_v8 = vmul.f32 %v2937_v7, %v3500_v28 }
 0x841   : > { %v2637_v12 = vpack.c.bf16 %v1548_v60, %v1548_v60  ;;  %v1536_v9 = vmul.f32 %v3554_v0, %v1522_v8 }
 0x842   : > { %v2939_v59 = vpop.eup %2938 }
 0x843   : > { %1589 = vst.msk [vmem:[%s3569_s30] sm:$0xf] %vm1588_vm7, %v2637_v12  ;;  %v1550_v17 = vadd.f32 %v3559_v14, %v1536_v9  ;;  %v1524_v16 = vmul.f32 %v2939_v59, %v3503_v25 }
 0x845   : > { %v2639_v18 = vpack.c.bf16 %v1550_v17, %v1550_v17  ;;  %v1538_v19 = vmul.f32 %v3554_v0, %v1524_v16 }
 0x846   : > { %v2941_v26 = vpop.eup %2940 }
 0x847   : > { %1591 = vst.msk [vmem:[%s3569_s30 + $0x8] sm:$0xf] %vm1588_vm7, %v2639_v18  ;;  %v1552_v27 = vadd.f32 %v3559_v14, %v1538_v19  ;;  %v1526_v6 = vmul.f32 %v2941_v26, %v3508_v34 }
 0x849   : > { %v2641_v28 = vpack.c.bf16 %v1552_v27, %v1552_v27  ;;  %v1540_v29 = vmul.f32 %v3554_v0, %v1526_v6 }
 0x84b   : > { %1593 = vst.msk [vmem:[%s3569_s30 + $0x10] sm:$0xf] %vm1588_vm7, %v2641_v28  ;;  %v1554_v23 = vadd.f32 %v3559_v14, %v1540_v29 }
 0x84d   : > { %v2643_v22 = vpack.c.bf16 %v1554_v23, %v1554_v23 }
 0x84f   : > { %1595 = vst.msk [vmem:[%s3569_s30 + $0x18] sm:$0xf] %vm1588_vm7, %v2643_v22 }
 0x87d   : > { %v2258_v25 = vpop.f32.mrb[36].mxu1 }
 0x87e   : > { %v2259_v30 = vadd.f32 %v2618_v24, %v2258_v25  ;;  %v2790_v31 = vpop.f32.mrb[37].mxu1 }
 0x87f   : > { %v2261_v32 = vpop.f32.mrb[38].mxu1 }
 0x880   : > { %v2264_v33 = vmul.f32 %v2259_v30, %v2259_v30  ;;  %v2791_v34 = vpop.f32.mrb[39].mxu1 }
 0x882   : > { %v2265_v46 = vmul.f32 %v2264_v33, %v2259_v30 }
 0x884   : > { %v2266_v20 = vmul.f32 0.044715, %v2265_v46 }
 0x886   : > { %v2267_v54 = vadd.f32 %v2266_v20, %v2259_v30 }
 0x888   : > { %v2268_v63 = vmul.f32 0.7978846, %v2267_v54 }
 0x88a   : > { %2942 = vtanh.f32 %v2268_v63 }
 0x894   : > { %v2943_v36 = vpop.eup %2942 }
 0x895   : > { %v2270_v37 = vadd.f32 1.0, %v2943_v36 }
 0x897   : > { %v2271_v38 = vmul.f32 0.5, %v2270_v37 }
 0x899   : > { %v2272_v39 = vmul.f32 %v2271_v38, %v2259_v30 }
 0x89b   : > { %v2273_v42 = vpack.c.bf16 %v2272_v39, %v2272_v39 }
 0x89d   : > { %2801 = vmatmul.mubr.msk.bf16.vlgmr.msra.gmra.mrb[28].mxu0 %vm2313_vm8, %v2273_v42 }
 0x970   : > { %v2351_v41 = vpop.f32.mrb[28].mxu0 }
 0x971   : > { %v2352_v51 = vadd.f32 %v2622_v45, %v2351_v41  ;;  %v2802_v52 = vpop.f32.mrb[29].mxu0 }
 0x972   : > { %v2354_v4 = vpop.f32.mrb[30].mxu0 }
 0x973   : > { %v2803_v53 = vpop.f32.mrb[31].mxu0  ;;  %v2357_v35 = vadd.f32 %v2352_v51, %v3522_v40  ;;  %v1481_v40 = vsel %vm952_vm2, %v1467_v57, 0.0 }
 0x975   : > { %v2360_v43 = vsel %vm851_vm1, %v2357_v35, 0.0 }
 0x976   : > { %2361 = vadd.xlane.f32.xlu1 %v2360_v43 }
 0x97a   : > { %1476 = vadd.xlane.f32.xlu1 %v1475_v11 }
 0x97e   : > { %1482 = vadd.xlane.f32.xlu1 %v1481_v40 }
 0x982   : > { %1488 = vadd.xlane.f32.xlu1 %v1487_v3 }
 0x986   : > { %1494 = vadd.xlane.f32.xlu1 %v1493_v2 }
 0xa03   : > { %v2362_v13 = vpop.xlane.xlu1 %2361 }
 0xa04   : > { %v2363_v5 = vmul.f32 0.03125, %v2362_v13 }
 0xa06   : > { %v2364_v50 = vsub.f32 %v2357_v35, %v2363_v5 }
 0xa07   : > { %v1477_v10 = vpop.xlane.xlu1 %1476 }
 0xa08   : > { %v1497_v7 = vmul.f32 0.0625, %v1477_v10  ;;  %v2365_v60 = vmul.f32 %v2364_v50, %v2364_v50 }
 0xa0a   : > { %v1505_v8 = vadd.f32 1e-05, %v1497_v7  ;;  %v2366_v15 = vsel %vm851_vm1, %v2365_v60, 0.0 }
 0xa0b   : > { %2367 = vadd.xlane.f32.xlu0 %v2366_v15  ;;  %v1483_v12 = vpop.xlane.xlu1 %1482 }
 0xa0c   : > { %2944 = vrsqrt.f32 %v1505_v8  ;;  %v1499_v9 = vmul.f32 0.0625, %v1483_v12 }
 0xa0e   : > { %v1507_v59 = vadd.f32 1e-05, %v1499_v9 }
 0xa0f   : > { %v1489_v17 = vpop.xlane.xlu1 %1488 }
 0xa10   : > { %2946 = vrsqrt.f32 %v1507_v59  ;;  %v1501_v16 = vmul.f32 0.0625, %v1489_v17 }
 0xa12   : > { %v1509_v18 = vadd.f32 1e-05, %v1501_v16 }
 0xa13   : > { %v1495_v19 = vpop.xlane.xlu1 %1494 }
 0xa14   : > { %2948 = vrsqrt.f32 %v1509_v18  ;;  %v1503_v26 = vmul.f32 0.0625, %v1495_v19 }
 0xa16   : > { %v2945_v27 = vpop.eup %2944  ;;  %v1511_v6 = vadd.f32 1e-05, %v1503_v26 }
 0xa17   : > { %v1521_v28 = vmul.f32 %v2945_v27, %v1457_v47  ;;  %v2628_v47 = vld [vmem:[%s3702_s19] ss:$0 sm:$0xff] }
 0xa18   : > { %2950 = vrsqrt.f32 %v1511_v6 }
 0xa19   : > { %v1535_v29 = vmul.f32 %v3554_v0, %v1521_v28 }
 0xa1a   : > { %v2947_v23 = vpop.eup %2946 }
 0xa1b   : > { %v1549_v22 = vadd.f32 %v3559_v14, %v1535_v29  ;;  %v1523_v24 = vmul.f32 %v2947_v23, %v1459_v55 }
 0xa1d   : > { %v2638_v25 = vpack.c.bf16 %v1549_v22, %v1549_v22  ;;  %v1537_v30 = vmul.f32 %v3554_v0, %v1523_v24 }
 0xa1e   : > { %v2949_v31 = vpop.eup %2948 }
 0xa1f   : > { %1590 = vst.msk [vmem:[%s3569_s30 + $0x4] sm:$0xf] %vm1588_vm7, %v2638_v25  ;;  %v1551_v32 = vadd.f32 %v3559_v14, %v1537_v30  ;;  %v1525_v33 = vmul.f32 %v2949_v31, %v1461_v58 }
 0xa21   : > { %v2640_v34 = vpack.c.bf16 %v1551_v32, %v1551_v32  ;;  %v1539_v46 = vmul.f32 %v3554_v0, %v1525_v33 }
 0xa22   : > { %v2951_v20 = vpop.eup %2950 }
 0xa23   : > { %1592 = vst.msk [vmem:[%s3569_s30 + $0xc] sm:$0xf] %vm1588_vm7, %v2640_v34  ;;  %v1553_v54 = vadd.f32 %v3559_v14, %v1539_v46  ;;  %v1527_v63 = vmul.f32 %v2951_v20, %v1463_v61 }
 0xa25   : > { %v2642_v36 = vpack.c.bf16 %v1553_v54, %v1553_v54  ;;  %v1541_v37 = vmul.f32 %v3554_v0, %v1527_v63 }
 0xa27   : > { %1594 = vst.msk [vmem:[%s3569_s30 + $0x14] sm:$0xf] %vm1588_vm7, %v2642_v36  ;;  %v1555_v38 = vadd.f32 %v3559_v14, %v1541_v37  ;;  %v2629_v14 = vld [vmem:[%s3703_s20] ss:$0 sm:$0xff] }
 0xa29   : > { %v2644_v39 = vpack.c.bf16 %v1555_v38, %v1555_v38 }
 0xa2b   : > { %1596 = vst.msk [vmem:[%s3569_s30 + $0x1c] sm:$0xf] %vm1588_vm7, %v2644_v39  ;;  %s2412_s30 = sshll.u32 %s782_s1, 4  ;;  %s3637_s30 = int_to_ptr.vmem [resolvable:$true] %s2412_s30 }
 0xa2c   : > { %s2954_s0 = scalar_lea.vmem %s3637_s30, 128  ;;  %p2961_p1 = scmp.lt.s32.totalorder %s3637_s30, %s2959_s27 }
 0xa2d   : > { %p2955_p12 = scmp.ne.s32.totalorder %s3637_s30, %s2954_s0  ;;  %p2962_p2 = scmp.lt.s32.totalorder %s2960_s4, %s2954_s0 }
 0xa2f   : > { %p2956_p13 = pnand %p2955_p12, %p3215_p4  ;;  %p2963_p3 = por %p2962_p2, %p2961_p1 }
 0xa31   : > { %p2957_p0 = pneg %p2956_p13 }
 0xa33   : > { %p2964_p5 = pnand %p2963_p3, %p2957_p0 }
 0xa98   : > { %v2368_v42 = vpop.xlane.xlu0 %2367 }
 0xa99   : > { %v2369_v44 = vmul.f32 0.03125, %v2368_v42 }
 0xa9b   : > { %v2370_v45 = vadd.f32 1e-05, %v2369_v44 }
 0xa9d   : > { %2952 = vrsqrt.f32 %v2370_v45 }
 0xaa7   : > { %v2953_v41 = vpop.eup %2952 }
 0xaa8   : > { %v2372_v0 = vmul.f32 %v2953_v41, %v2364_v50 }
 0xaaa   : > { %v2379_v48 = vmul.f32 %v2628_v47, %v2372_v0 }
 0xaac   : > { %v2386_v51 = vadd.f32 %v2629_v14, %v2379_v48 }
 0xaae   : > { %2387 = vst.msk [vmem:[%s782_s1] sm:$0xff] %vm851_vm1, %v2386_v51 }
 0xaaf   : > { %2967 = shalt.err (!%p2964_p5)
}
 0xab0   : > { %s2968_s9 = scalar_lea.hbm %s3635_s11, 128  ;;  %s2972_s25 = scalar_lea.hbm %s3749_s10, 256 }
 0xab1   : > { %p2969_p6 = scmp.ne.s32.totalorder %s3635_s11, %s2968_s9  ;;  %p2973_p10 = scmp.lt.u32.totalorder %s3635_s11, %s3749_s10 }
 0xab2   : > { %p2974_p11 = scmp.lt.u32.totalorder %s2972_s25, %s2968_s9  ;;  %p2976_p13 = scmp.lt.u32.totalorder %s2968_s9, %s3635_s11 }
 0xab3   : > { %p2970_p7 = pnand %p2969_p6, %p3215_p4 }
 0xab4   : > { %p2975_p12 = por %p2974_p11, %p2973_p10 }
 0xab5   : > { %p2971_p9 = pneg %p2970_p7 }
 0xab6   : > { %p2977_p0 = por %p2976_p13, %p2975_p12 }
 0xab8   : > { %p2978_p1 = pnand %p2977_p0, %p2971_p9 }
 0xaba   : > { %2981 = shalt.err (!%p2978_p1)
}
 0xabb   : > { %2806 = dma.vmem_to_hbm [thread:$0]  (%p3215_p4), %s3637_s30, 128, %s3635_s11, %s2389_s7  }
 0xabc PF: > { %s3750_s0 = sld [smem:[#allocation9_spill]]  ;;  %p2812_p2 = scmp.ge.s32.totalorder %s3032_s2, 2 }
 0xabe   : > { %p2809_p3 = pnand %p2812_p2, %p3222_p8 }
 0xac2   : > { %s2428_s28 = sand.u32 1, %s3750_s0  }
 0xac3   : > { %s2429_s27 = scalar_lea.sflag [#allocation7], %s2428_s28 }
 0xac4   : > { %3007 = dma.done.wait (!%p2809_p3), %s2429_s27, 128  }
 0xac5   : > { %3009 = vsyncadd (!%p2809_p3), %s2429_s27, 4294967168  ;;  %s38_s2 = sadd.s32 1, %s3032_s2   ;;  %s3751_s4 = sld [smem:[#allocation10_spill]] }
 0xac6   : > { %p35_p5 = scmp.ge.s32.totalorder %s38_s2, 4   ;;  %s3752_s27 = sld [smem:[#allocation13_spill]] }
 0xac7   : > { %s3753_s28 = sld [smem:[#allocation11_spill]]  ;;  %s3754_s6 = sld [smem:[#allocation12_spill]] }
 0xac8   : > { %s3755_s5 = smov %s3016_s26  ;;  %37 = sbr.rel (!%p35_p5) target bundleno = 18 (0x12), region = 174 }
 0xacb   : > { %s3756_s26 = smov %s3751_s4 }
 0xacf   :  { %2446 = vsyncpa [#allocation7], 1 }
 0xad0   :  { %2448 = vsyncpa [#allocation7 + $0x1], 1 }

</bundles_post_ra>
